<compile_context>
chip_gen: v7x
topology: tpu7x:2x2x1
jax: 0.10.0
libtpu: 0.0.40
codegen_flags: <defaults>
</compile_context>

<pallas_src>
import jax
import jax.numpy as jnp
from jax.experimental import pallas as pl
from jax.experimental.pallas import tpu as pltpu


def _round_up(v, m):
    return -(-v // m) * m


# ----------------------------- Pallas kernel ------------------------------ #
def decoder_kernel(x_ref, h_ref, enc_ref, encf_ref,
                   w_h_ref, w_x_ref, w_e2_ref, w_hn_ref, bias_ref,
                   pred_ref, hnew_ref):
    f32 = jnp.float32
    x = x_ref[...]            # [TB, dec_in]
    h = h_ref[...]            # [TB, HP]      (lanes >= H are zero)
    enc = enc_ref[...]        # [TB, S, E2]
    encf = encf_ref[...]      # [TB*S, E2]    (pre-flattened view of enc)
    TB, HP = h.shape
    S = enc.shape[1]
    NP = pred_ref.shape[1]

    # bias slab, all slices 128-lane aligned
    b_attn = bias_ref[:, 0:HP]                       # [1, HP]
    v_attn = bias_ref[:, HP:2 * HP]                  # [1, HP]
    b_gi = bias_ref[:, 2 * HP:5 * HP]                # [1, 3HP]  (token-emb + pos already folded)
    b_gh = bias_ref[:, 5 * HP:8 * HP]                # [1, 3HP]
    b_pred = bias_ref[:, 8 * HP:8 * HP + NP]         # [1, NP]   (token-emb + pos already folded)

    # --- everything that consumes the old hidden state: [attn_h | gru r | z | n] -------------
    h_all = jnp.dot(h, w_h_ref[...], preferred_element_type=f32)        # [TB, 4HP]
    h_proj = h_all[:, 0:HP]                                             # [TB, HP]
    gh = h_all[:, HP:4 * HP] + b_gh                                     # [TB, 3HP]

    # --- everything that consumes the raw decoder input (embedding folded): [r|z|n|pred] -----
    x_all = jnp.dot(x, w_x_ref[...], preferred_element_type=f32)        # [TB, 3HP+NP]

    # --- additive attention ------------------------------------------------------------------
    e_proj = jnp.dot(encf, w_e2_ref[:, 0:HP],
                     preferred_element_type=f32).reshape(TB, S, HP)     # [TB, S, HP]
    energy = jnp.tanh(h_proj[:, None, :] + e_proj + b_attn[None, :, :])
    score = jnp.sum(energy * v_attn[None, :, :], axis=-1, keepdims=True)  # [TB, S, 1]
    score = score - jnp.max(score, axis=1, keepdims=True)
    p = jnp.exp(score)
    a = p * pl.reciprocal(jnp.sum(p, axis=1, keepdims=True), approx=True)  # [TB, S, 1]

    # weighted = bmm(a, encoder_outputs)  (S is tiny -> multiply + sublane reduce)
    weighted = jnp.sum(a * enc, axis=1)                                  # [TB, E2]

    # --- everything that consumes `weighted`: [gru r | z | n | pred] --------------------------
    w_all = jnp.dot(weighted, w_e2_ref[:, HP:4 * HP + NP],
                    preferred_element_type=f32)                          # [TB, 3HP+NP]

    # --- GRU single step (gates 128-lane aligned, PyTorch order r, z, n) ----------------------
    gi = x_all[:, 0:3 * HP] + w_all[:, 0:3 * HP] + b_gi
    r = jax.nn.sigmoid(gi[:, 0:HP] + gh[:, 0:HP])
    z = jax.nn.sigmoid(gi[:, HP:2 * HP] + gh[:, HP:2 * HP])
    n = jnp.tanh(gi[:, 2 * HP:3 * HP] + r * gh[:, 2 * HP:3 * HP])
    h_new = (1.0 - z) * n + z * h                                        # [TB, HP] (pad lanes = 0)

    # --- prediction = fc_out(cat(output, weighted, embedded)) ---------------------------------
    pred = (jnp.dot(h_new, w_hn_ref[...], preferred_element_type=f32)
            + x_all[:, 3 * HP:3 * HP + NP] + w_all[:, 3 * HP:3 * HP + NP] + b_pred)  # [TB, NP]

    pred_ref[...] = pred.astype(pred_ref.dtype)
    hnew_ref[...] = h_new.astype(hnew_ref.dtype)


# ------------------------- offline weight preparation ---------------------- #
def prepare_params(p):
    """Offline weight fusion / lane-padding.  Builds 5 slabs:
       W_H  [HP, 4HP]        old hidden  -> [attn_h | gru r | z | n]
       W_X  [dec_in, 3HP+NP] raw input   -> [gru r | z | n | pred]  (token embedding folded in)
       W_E2 [E2, 4HP+NP]     enc feature -> [attn_e | gru r | z | n | pred]
       W_HN [HP, NP]         new hidden  -> [pred]
       BIAS [1, 8HP+NP]      [b_attn | v_attn | b_gi(r|z|n) | b_gh(r|z|n) | b_pred]
    """
    hp = jax.lax.Precision.HIGHEST
    dec_in, emb_dim = p['w_tok'].shape
    H = p['w_hh'].shape[0]
    E2 = p['w_attn'].shape[0] - H
    HP = _round_up(H, 128)
    NP = _round_up(dec_in, 128)

    w_attn_h, w_attn_e = p['w_attn'][:H], p['w_attn'][H:]
    w_ih_e, w_ih_w = p['w_ih'][:emb_dim], p['w_ih'][emb_dim:]
    w_fc_h, w_fc_w, w_fc_e = p['w_fc'][:H], p['w_fc'][H:H + E2], p['w_fc'][H + E2:]

    # fold TokenEmbedding (seq_len==1 circular conv) + position-0 PE into downstream weights/biases
    w_x_gi = jnp.dot(p['w_tok'], w_ih_e, precision=hp)              # [dec_in, 3H]
    w_x_fc = jnp.dot(p['w_tok'], w_fc_e, precision=hp)              # [dec_in, dec_in]
    b_gi = p['b_ih'] + jnp.dot(p['pos'], w_ih_e, precision=hp)[0]   # [3H]
    b_pred = p['b_fc'] + jnp.dot(p['pos'], w_fc_e, precision=hp)[0]  # [dec_in]

    pad_c = lambda w, n: jnp.pad(w, ((0, 0), (0, n - w.shape[1])))
    pad_r = lambda w, n: jnp.pad(w, ((0, n - w.shape[0]), (0, 0)))
    pad_v = lambda v, n: jnp.pad(v, (0, n - v.shape[0]))
    gate_c = lambda w: jnp.concatenate([pad_c(w[:, g * H:(g + 1) * H], HP) for g in range(3)], 1)
    gate_v = lambda v: jnp.concatenate([pad_v(v[g * H:(g + 1) * H], HP) for g in range(3)])

    W_H = pad_r(jnp.concatenate([pad_c(w_attn_h, HP), gate_c(p['w_hh'])], 1), HP)
    W_X = jnp.concatenate([gate_c(w_x_gi), pad_c(w_x_fc, NP)], 1)
    W_E2 = jnp.concatenate([pad_c(w_attn_e, HP), gate_c(w_ih_w), pad_c(w_fc_w, NP)], 1)
    W_HN = pad_r(pad_c(w_fc_h, NP), HP)
    BIAS = jnp.concatenate([pad_v(p['b_attn'], HP), pad_v(p['v_attn'], HP),
                            gate_v(b_gi), gate_v(p['b_hh']), pad_v(b_pred, NP)]).reshape(1, -1)
    return dict(W_H=W_H, W_X=W_X, W_E2=W_E2, W_HN=W_HN, BIAS=BIAS)


# ------------------------------ JAX wrapper ------------------------------- #
@jax.jit
def decoder_forward(x, hidden, enc_outs, slabs):
    B, _, dec_in = x.shape
    H = hidden.shape[1]
    S, E2 = enc_outs.shape[1], enc_outs.shape[2]
    HP = slabs['W_H'].shape[0]
    NP = slabs['W_HN'].shape[1]

    # Batch tiling: cap the tile at 128 rows (VMEM safety on v7x) and use >= 2 grid steps
    # whenever B allows so the "parallel" axis can shard across a v7x megacore.
    TB = min(B, 128)
    if B >= 16:
        TB = min(128, _round_up(pl.cdiv(B, 2), 8))
    B_pad = _round_up(B, TB)
    nb = B_pad // TB

    def pad_batch(a):
        return jnp.pad(a, ((0, B_pad - B),) + ((0, 0),) * (a.ndim - 1))

    x2 = pad_batch(x.reshape(B, dec_in))
    h_pad = pad_batch(jnp.pad(hidden, ((0, 0), (0, HP - H))))      # lane-padded hidden
    enc = pad_batch(enc_outs)
    enc_flat = enc.reshape(B_pad * S, E2)                          # pre-flattened attention view

    def tiled(shape):
        nd = len(shape)
        return pl.BlockSpec(shape, lambda i, _n=nd: (i,) + (0,) * (_n - 1))

    def rep(a):
        nd = a.ndim
        return pl.BlockSpec(a.shape, lambda i, _n=nd: (0,) * _n)

    in_specs = [tiled((TB, dec_in)), tiled((TB, HP)), tiled((TB, S, E2)), tiled((TB * S, E2)),
                rep(slabs['W_H']), rep(slabs['W_X']), rep(slabs['W_E2']),
                rep(slabs['W_HN']), rep(slabs['BIAS'])]

    pred_pad, hnew_pad = pl.pallas_call(
        decoder_kernel,
        out_shape=(jax.ShapeDtypeStruct((B_pad, NP), jnp.float32),
                   jax.ShapeDtypeStruct((B_pad, HP), jnp.float32)),
        grid=(nb,),
        in_specs=in_specs,
        out_specs=(tiled((TB, NP)), tiled((TB, HP))),
        input_output_aliases={1: 1},          # padded hidden buffer is reused for h_new
        compiler_params=pltpu.CompilerParams(dimension_semantics=("parallel",)),
    )(x2, h_pad, enc, enc_flat,
      slabs['W_H'], slabs['W_X'], slabs['W_E2'], slabs['W_HN'], slabs['BIAS'])

    # prediction has shape [B, 1, dec_in] in the PyTorch module
    return pred_pad[:B, :dec_in].reshape(B, 1, dec_in), hnew_pad[:B, :H]


# --------------------------- parameter building --------------------------- #
def init_params(key, dec_in, emb_dim, enc_hid, dec_hid):
    E2 = 2 * enc_hid
    H = dec_hid
    ks = jax.random.split(key, 10)
    s = 0.1
    nrm = lambda k, shp: jax.random.normal(k, shp, jnp.float32) * s

    # TokenEmbedding: Conv1d(dec_in, emb_dim, k=3, circular, bias=False); seq_len==1 collapses
    # the circular conv exactly to x @ (sum of the 3 taps).
    conv_w = nrm(ks[0], (emb_dim, dec_in, 3))
    w_tok = jnp.sum(conv_w, axis=-1).T                               # [dec_in, emb]
    # Fixed sinusoidal positional embedding at position 0 (sin(0)=0, cos(0)=1 interleaved).
    pos = jnp.zeros((1, emb_dim), jnp.float32).at[0, 1::2].set(1.0)

    # Additive attention: Linear(H + E2 -> H) on cat(hidden, enc_outs); v: H -> 1.
    w_attn = nrm(ks[1], (H + E2, H))
    b_attn = nrm(ks[2], (H,))
    v_attn = nrm(ks[3], (H,))

    # GRU, input = cat(embedded, weighted); PyTorch gate order (r | z | n), weights transposed.
    w_ih = nrm(ks[4], (emb_dim + E2, 3 * H))
    b_ih = nrm(ks[5], (3 * H,))
    w_hh = nrm(ks[6], (H, 3 * H))
    b_hh = nrm(ks[7], (3 * H,))

    # fc_out: Linear(H + E2 + emb -> dec_in) on cat(output, weighted, embedded).
    w_fc = nrm(ks[8], (H + E2 + emb_dim, dec_in))
    b_fc = nrm(ks[9], (dec_in,))

    return dict(w_tok=w_tok, pos=pos, w_attn=w_attn, b_attn=b_attn, v_attn=v_attn,
                w_ih=w_ih, b_ih=b_ih, w_hh=w_hh, b_hh=b_hh, w_fc=w_fc, b_fc=b_fc)


# --------------------------- pure-JAX reference ---------------------------- #
def decoder_reference(x, hidden, enc, p):
    hp = jax.lax.Precision.HIGHEST
    B, _, dec_in = x.shape
    H = hidden.shape[1]
    x2 = x.reshape(B, dec_in)

    emb = jnp.dot(x2, p['w_tok'], precision=hp) + p['pos']
    w_attn_h, w_attn_e = p['w_attn'][:H], p['w_attn'][H:]
    e_proj = jnp.einsum('bse,eh->bsh', enc, w_attn_e, precision=hp)
    energy = jnp.tanh(jnp.dot(hidden, w_attn_h, precision=hp)[:, None, :] + e_proj + p['b_attn'])
    score = jnp.sum(energy * p['v_attn'], axis=-1)
    a = jax.nn.softmax(score, axis=1)
    weighted = jnp.einsum('bs,bse->be', a, enc, precision=hp)

    rnn_in = jnp.concatenate([emb, weighted], axis=-1)
    gi = jnp.dot(rnn_in, p['w_ih'], precision=hp) + p['b_ih']
    gh = jnp.dot(hidden, p['w_hh'], precision=hp) + p['b_hh']
    r = jax.nn.sigmoid(gi[:, :H] + gh[:, :H])
    z = jax.nn.sigmoid(gi[:, H:2 * H] + gh[:, H:2 * H])
    n = jnp.tanh(gi[:, 2 * H:] + r * gh[:, 2 * H:])
    h_new = (1.0 - z) * n + z * hidden

    pred = jnp.dot(jnp.concatenate([h_new, weighted, emb], -1), p['w_fc'], precision=hp) + p['b_fc']
    return pred.reshape(B, 1, dec_in), h_new


# --------------------------------- main ----------------------------------- #
if __name__ == "__main__":
    B, S = 8, 8                                          # B=8 fills all f32 sublanes per vreg
    dec_in, emb_dim, enc_hid, dec_hid = 4, 16, 16, 32    # encoder feature = 2*enc_hid = 32

    key = jax.random.PRNGKey(0)
    kx, kh, ke, kp = jax.random.split(key, 4)
    x = jax.random.normal(kx, (B, 1, dec_in), jnp.float32)          # decoder input (one step)
    hidden = jax.random.normal(kh, (B, dec_hid), jnp.float32)       # previous decoder hidden
    enc_outs = jax.random.normal(ke, (B, S, 2 * enc_hid), jnp.float32)

    params = init_params(kp, dec_in, emb_dim, enc_hid, dec_hid)
    slabs = prepare_params(params)                                   # offline fold + pad

    pred, h_new = decoder_forward(x, hidden, enc_outs, slabs)
    pred = jax.block_until_ready(pred)
    h_new = jax.block_until_ready(h_new)

    pred_ref, h_ref = decoder_reference(x, hidden, enc_outs, params)
    assert pred.shape == (B, 1, dec_in) and h_new.shape == (B, dec_hid)
    assert jnp.allclose(pred, pred_ref, atol=2e-3, rtol=2e-3), \
        float(jnp.max(jnp.abs(pred - pred_ref)))
    assert jnp.allclose(h_new, h_ref, atol=2e-3, rtol=2e-3), \
        float(jnp.max(jnp.abs(h_new - h_ref)))

    print("KERNEL_OK")
</pallas_src>

<mosaic_0001>
module attributes {stable_mosaic.version = 11 : i64} {
  func.func @decoder_kernel(%arg0: i32, %arg1: memref<8x4xf32, #tpu.memory_space<vmem>>, %arg2: memref<8x128xf32, #tpu.memory_space<vmem>>, %arg3: memref<8x8x32xf32, #tpu.memory_space<vmem>>, %arg4: memref<64x32xf32, #tpu.memory_space<vmem>>, %arg5: memref<128x512xf32, #tpu.memory_space<vmem>>, %arg6: memref<4x512xf32, #tpu.memory_space<vmem>>, %arg7: memref<32x640xf32, #tpu.memory_space<vmem>>, %arg8: memref<128x128xf32, #tpu.memory_space<vmem>>, %arg9: memref<1x1152xf32, #tpu.memory_space<vmem>>, %arg10: memref<8x128xf32, #tpu.memory_space<vmem>>, %arg11: memref<8x128xf32, #tpu.memory_space<vmem>>) attributes {dimension_semantics = [#tpu.dimension_semantics<parallel>], iteration_bounds = array<i64: 1>, scalar_prefetch = 0 : i64, scratch_operands = 0 : i64, tpu.core_type = #tpu.core_type<tc>, window_params = [{transform_indices = @transform_0, window_bounds = array<i64: 8, 4>}, {transform_indices = @transform_1, window_bounds = array<i64: 8, 128>}, {transform_indices = @transform_2, window_bounds = array<i64: 8, 8, 32>}, {transform_indices = @transform_3, window_bounds = array<i64: 64, 32>}, {pipeline_mode = #tpu.pipeline_mode<synchronous>, transform_indices = @transform_4, window_bounds = array<i64: 128, 512>}, {pipeline_mode = #tpu.pipeline_mode<synchronous>, transform_indices = @transform_5, window_bounds = array<i64: 4, 512>}, {pipeline_mode = #tpu.pipeline_mode<synchronous>, transform_indices = @transform_6, window_bounds = array<i64: 32, 640>}, {pipeline_mode = #tpu.pipeline_mode<synchronous>, transform_indices = @transform_7, window_bounds = array<i64: 128, 128>}, {pipeline_mode = #tpu.pipeline_mode<synchronous>, transform_indices = @transform_8, window_bounds = array<i64: 1, 1152>}, {transform_indices = @transform_9, window_bounds = array<i64: 8, 128>}, {transform_indices = @transform_10, window_bounds = array<i64: 8, 128>}]} {
    %c0 = arith.constant 0 : index
    %c0_0 = arith.constant 0 : index
    %0 = vector.load %arg1[%c0, %c0_0] : memref<8x4xf32, #tpu.memory_space<vmem>>, vector<8x4xf32>
    %c0_1 = arith.constant 0 : index
    %c0_2 = arith.constant 0 : index
    %1 = vector.load %arg2[%c0_1, %c0_2] : memref<8x128xf32, #tpu.memory_space<vmem>>, vector<8x128xf32>
    %c0_3 = arith.constant 0 : index
    %c0_4 = arith.constant 0 : index
    %c0_5 = arith.constant 0 : index
    %2 = vector.load %arg3[%c0_3, %c0_4, %c0_5] : memref<8x8x32xf32, #tpu.memory_space<vmem>>, vector<8x8x32xf32>
    %c0_6 = arith.constant 0 : index
    %c0_7 = arith.constant 0 : index
    %3 = vector.load %arg4[%c0_6, %c0_7] : memref<64x32xf32, #tpu.memory_space<vmem>>, vector<64x32xf32>
    %c0_8 = arith.constant 0 : index
    %c0_9 = arith.constant 0 : index
    %4 = vector.load %arg9[%c0_8, %c0_9] : memref<1x1152xf32, #tpu.memory_space<vmem>>, vector<1x128xf32>
    %c0_10 = arith.constant 0 : index
    %c128 = arith.constant 128 : index
    %5 = vector.load %arg9[%c0_10, %c128] : memref<1x1152xf32, #tpu.memory_space<vmem>>, vector<1x128xf32>
    %c0_11 = arith.constant 0 : index
    %c256 = arith.constant 256 : index
    %6 = vector.load %arg9[%c0_11, %c256] : memref<1x1152xf32, #tpu.memory_space<vmem>>, vector<1x384xf32>
    %c0_12 = arith.constant 0 : index
    %c640 = arith.constant 640 : index
    %7 = vector.load %arg9[%c0_12, %c640] : memref<1x1152xf32, #tpu.memory_space<vmem>>, vector<1x384xf32>
    %c0_13 = arith.constant 0 : index
    %c1024 = arith.constant 1024 : index
    %8 = vector.load %arg9[%c0_13, %c1024] : memref<1x1152xf32, #tpu.memory_space<vmem>>, vector<1x128xf32>
    %c0_14 = arith.constant 0 : index
    %c0_15 = arith.constant 0 : index
    %9 = vector.load %arg5[%c0_14, %c0_15] : memref<128x512xf32, #tpu.memory_space<vmem>>, vector<128x512xf32>
    %cst = arith.constant dense<0.000000e+00> : vector<8x512xf32>
    %10 = tpu.matmul %1, %9, %cst {dimension_numbers = #tpu.dot_dimension_numbers<[1], [0], [0], [1], [0, 0, 1, 1], [], []>} : vector<8x128xf32>, vector<128x512xf32>, vector<8x512xf32> -> vector<8x512xf32>
    %11 = vector.extract_strided_slice %10 {offsets = [0, 0], sizes = [8, 128], strides = [1, 1]} : vector<8x512xf32> to vector<8x128xf32>
    %12 = vector.extract_strided_slice %10 {offsets = [0, 128], sizes = [8, 384], strides = [1, 1]} : vector<8x512xf32> to vector<8x384xf32>
    %13 = vector.broadcast %7 : vector<1x384xf32> to vector<8x384xf32>
    %14 = arith.addf %12, %13 : vector<8x384xf32>
    %c0_16 = arith.constant 0 : index
    %c0_17 = arith.constant 0 : index
    %15 = vector.load %arg6[%c0_16, %c0_17] : memref<4x512xf32, #tpu.memory_space<vmem>>, vector<4x512xf32>
    %cst_18 = arith.constant dense<0.000000e+00> : vector<8x512xf32>
    %16 = tpu.matmul %0, %15, %cst_18 {dimension_numbers = #tpu.dot_dimension_numbers<[1], [0], [0], [1], [0, 0, 1, 1], [], []>} : vector<8x4xf32>, vector<4x512xf32>, vector<8x512xf32> -> vector<8x512xf32>
    %c0_19 = arith.constant 0 : index
    %c0_20 = arith.constant 0 : index
    %17 = vector.load %arg7[%c0_19, %c0_20] : memref<32x640xf32, #tpu.memory_space<vmem>>, vector<32x128xf32>
    %cst_21 = arith.constant dense<0.000000e+00> : vector<64x128xf32>
    %18 = tpu.matmul %3, %17, %cst_21 {dimension_numbers = #tpu.dot_dimension_numbers<[1], [0], [0], [1], [0, 0, 1, 1], [], []>} : vector<64x32xf32>, vector<32x128xf32>, vector<64x128xf32> -> vector<64x128xf32>
    %19 = vector.shape_cast %18 : vector<64x128xf32> to vector<8x8x128xf32>
    %20 = vector.shape_cast %11 : vector<8x128xf32> to vector<8x1x128xf32>
    %21 = vector.broadcast %20 : vector<8x1x128xf32> to vector<8x8x128xf32>
    %22 = arith.addf %21, %19 : vector<8x8x128xf32>
    %23 = vector.shape_cast %4 : vector<1x128xf32> to vector<1x1x128xf32>
    %24 = vector.broadcast %23 : vector<1x1x128xf32> to vector<8x8x128xf32>
    %25 = arith.addf %22, %24 : vector<8x8x128xf32>
    %26 = math.tanh %25 : vector<8x8x128xf32>
    %27 = vector.shape_cast %5 : vector<1x128xf32> to vector<1x1x128xf32>
    %28 = vector.broadcast %27 : vector<1x1x128xf32> to vector<8x8x128xf32>
    %29 = arith.mulf %26, %28 : vector<8x8x128xf32>
    %cst_22 = arith.constant dense<0.000000e+00> : vector<8x8xf32>
    %30 = vector.multi_reduction <add>, %29, %cst_22 [2] : vector<8x8x128xf32> to vector<8x8xf32>
    %31 = vector.shape_cast %30 : vector<8x8xf32> to vector<8x8x1xf32>
    %cst_23 = arith.constant dense<0xFF800000> : vector<8x1xf32>
    %32 = vector.multi_reduction <maximumf>, %31, %cst_23 [1] : vector<8x8x1xf32> to vector<8x1xf32>
    %33 = vector.shape_cast %32 : vector<8x1xf32> to vector<8x1x1xf32>
    %34 = vector.broadcast %33 : vector<8x1x1xf32> to vector<8x8x1xf32>
    %35 = arith.subf %31, %34 : vector<8x8x1xf32>
    %36 = math.exp %35 : vector<8x8x1xf32>
    %cst_24 = arith.constant dense<0.000000e+00> : vector<8x1xf32>
    %37 = vector.multi_reduction <add>, %36, %cst_24 [1] : vector<8x8x1xf32> to vector<8x1xf32>
    %38 = vector.shape_cast %37 : vector<8x1xf32> to vector<8x1x1xf32>
    %39 = tpu.reciprocal %38 {approx = true} : vector<8x1x1xf32> -> vector<8x1x1xf32>
    %40 = vector.broadcast %39 : vector<8x1x1xf32> to vector<8x8x1xf32>
    %41 = arith.mulf %36, %40 : vector<8x8x1xf32>
    %42 = vector.broadcast %41 : vector<8x8x1xf32> to vector<8x8x32xf32>
    %43 = arith.mulf %42, %2 : vector<8x8x32xf32>
    %cst_25 = arith.constant dense<0.000000e+00> : vector<8x32xf32>
    %44 = vector.multi_reduction <add>, %43, %cst_25 [1] : vector<8x8x32xf32> to vector<8x32xf32>
    %c0_26 = arith.constant 0 : index
    %c128_27 = arith.constant 128 : index
    %45 = vector.load %arg7[%c0_26, %c128_27] : memref<32x640xf32, #tpu.memory_space<vmem>>, vector<32x512xf32>
    %cst_28 = arith.constant dense<0.000000e+00> : vector<8x512xf32>
    %46 = tpu.matmul %44, %45, %cst_28 {dimension_numbers = #tpu.dot_dimension_numbers<[1], [0], [0], [1], [0, 0, 1, 1], [], []>} : vector<8x32xf32>, vector<32x512xf32>, vector<8x512xf32> -> vector<8x512xf32>
    %47 = vector.extract_strided_slice %16 {offsets = [0, 0], sizes = [8, 384], strides = [1, 1]} : vector<8x512xf32> to vector<8x384xf32>
    %48 = vector.extract_strided_slice %46 {offsets = [0, 0], sizes = [8, 384], strides = [1, 1]} : vector<8x512xf32> to vector<8x384xf32>
    %49 = arith.addf %47, %48 : vector<8x384xf32>
    %50 = vector.broadcast %6 : vector<1x384xf32> to vector<8x384xf32>
    %51 = arith.addf %49, %50 : vector<8x384xf32>
    %52 = vector.extract_strided_slice %51 {offsets = [0, 0], sizes = [8, 128], strides = [1, 1]} : vector<8x384xf32> to vector<8x128xf32>
    %53 = vector.extract_strided_slice %14 {offsets = [0, 0], sizes = [8, 128], strides = [1, 1]} : vector<8x384xf32> to vector<8x128xf32>
    %54 = arith.addf %52, %53 : vector<8x128xf32>
    %55 = arith.negf %54 : vector<8x128xf32>
    %56 = math.exp %55 : vector<8x128xf32>
    %cst_29 = arith.constant 1.000000e+00 : f32
    %57 = vector.broadcast %cst_29 : f32 to vector<8x128xf32>
    %58 = arith.addf %57, %56 : vector<8x128xf32>
    %59 = arith.divf %57, %58 : vector<8x128xf32>
    %60 = vector.extract_strided_slice %51 {offsets = [0, 128], sizes = [8, 128], strides = [1, 1]} : vector<8x384xf32> to vector<8x128xf32>
    %61 = vector.extract_strided_slice %14 {offsets = [0, 128], sizes = [8, 128], strides = [1, 1]} : vector<8x384xf32> to vector<8x128xf32>
    %62 = arith.addf %60, %61 : vector<8x128xf32>
    %63 = arith.negf %62 : vector<8x128xf32>
    %64 = math.exp %63 : vector<8x128xf32>
    %cst_30 = arith.constant 1.000000e+00 : f32
    %65 = vector.broadcast %cst_30 : f32 to vector<8x128xf32>
    %66 = arith.addf %65, %64 : vector<8x128xf32>
    %67 = arith.divf %65, %66 : vector<8x128xf32>
    %68 = vector.extract_strided_slice %51 {offsets = [0, 256], sizes = [8, 128], strides = [1, 1]} : vector<8x384xf32> to vector<8x128xf32>
    %69 = vector.extract_strided_slice %14 {offsets = [0, 256], sizes = [8, 128], strides = [1, 1]} : vector<8x384xf32> to vector<8x128xf32>
    %70 = arith.mulf %59, %69 : vector<8x128xf32>
    %71 = arith.addf %68, %70 : vector<8x128xf32>
    %72 = math.tanh %71 : vector<8x128xf32>
    %cst_31 = arith.constant 1.000000e+00 : f32
    %73 = vector.broadcast %cst_31 : f32 to vector<8x128xf32>
    %74 = arith.subf %73, %67 : vector<8x128xf32>
    %75 = arith.mulf %74, %72 : vector<8x128xf32>
    %76 = arith.mulf %67, %1 : vector<8x128xf32>
    %77 = arith.addf %75, %76 : vector<8x128xf32>
    %c0_32 = arith.constant 0 : index
    %c0_33 = arith.constant 0 : index
    %78 = vector.load %arg8[%c0_32, %c0_33] : memref<128x128xf32, #tpu.memory_space<vmem>>, vector<128x128xf32>
    %cst_34 = arith.constant dense<0.000000e+00> : vector<8x128xf32>
    %79 = tpu.matmul %77, %78, %cst_34 {dimension_numbers = #tpu.dot_dimension_numbers<[1], [0], [0], [1], [0, 0, 1, 1], [], []>} : vector<8x128xf32>, vector<128x128xf32>, vector<8x128xf32> -> vector<8x128xf32>
    %80 = vector.extract_strided_slice %16 {offsets = [0, 384], sizes = [8, 128], strides = [1, 1]} : vector<8x512xf32> to vector<8x128xf32>
    %81 = arith.addf %79, %80 : vector<8x128xf32>
    %82 = vector.extract_strided_slice %46 {offsets = [0, 384], sizes = [8, 128], strides = [1, 1]} : vector<8x512xf32> to vector<8x128xf32>
    %83 = arith.addf %81, %82 : vector<8x128xf32>
    %84 = vector.broadcast %8 : vector<1x128xf32> to vector<8x128xf32>
    %85 = arith.addf %83, %84 : vector<8x128xf32>
    %c0_35 = arith.constant 0 : index
    %c0_36 = arith.constant 0 : index
    %86 = vector.load %arg10[%c0_35, %c0_36] : memref<8x128xf32, #tpu.memory_space<vmem>>, vector<8x128xf32>
    tpu.vector_store %arg10[%c0_35, %c0_36], %85 {strides = array<i32>} : memref<8x128xf32, #tpu.memory_space<vmem>>, vector<8x128xf32>,
    %c0_37 = arith.constant 0 : index
    %c0_38 = arith.constant 0 : index
    %87 = vector.load %arg11[%c0_37, %c0_38] : memref<8x128xf32, #tpu.memory_space<vmem>>, vector<8x128xf32>
    tpu.vector_store %arg11[%c0_37, %c0_38], %77 {strides = array<i32>} : memref<8x128xf32, #tpu.memory_space<vmem>>, vector<8x128xf32>,
    return
  }
  func.func @transform_0(%arg0: i32) -> (i32, i32) {
    %c0_i32 = arith.constant 0 : i32
    %c0_i32_0 = arith.constant 0 : i32
    return %arg0, %c0_i32 : i32, i32
  }
  func.func @transform_1(%arg0: i32) -> (i32, i32) {
    %c0_i32 = arith.constant 0 : i32
    %c0_i32_0 = arith.constant 0 : i32
    return %arg0, %c0_i32 : i32, i32
  }
  func.func @transform_2(%arg0: i32) -> (i32, i32, i32) {
    %c0_i32 = arith.constant 0 : i32
    %c0_i32_0 = arith.constant 0 : i32
    %c0_i32_1 = arith.constant 0 : i32
    return %arg0, %c0_i32, %c0_i32_0 : i32, i32, i32
  }
  func.func @transform_3(%arg0: i32) -> (i32, i32) {
    %c0_i32 = arith.constant 0 : i32
    %c0_i32_0 = arith.constant 0 : i32
    return %arg0, %c0_i32 : i32, i32
  }
  func.func @transform_4(%arg0: i32) -> (i32, i32) {
    %c0_i32 = arith.constant 0 : i32
    %c0_i32_0 = arith.constant 0 : i32
    %c0_i32_1 = arith.constant 0 : i32
    return %c0_i32, %c0_i32_0 : i32, i32
  }
  func.func @transform_5(%arg0: i32) -> (i32, i32) {
    %c0_i32 = arith.constant 0 : i32
    %c0_i32_0 = arith.constant 0 : i32
    %c0_i32_1 = arith.constant 0 : i32
    return %c0_i32, %c0_i32_0 : i32, i32
  }
  func.func @transform_6(%arg0: i32) -> (i32, i32) {
    %c0_i32 = arith.constant 0 : i32
    %c0_i32_0 = arith.constant 0 : i32
    %c0_i32_1 = arith.constant 0 : i32
    return %c0_i32, %c0_i32_0 : i32, i32
  }
  func.func @transform_7(%arg0: i32) -> (i32, i32) {
    %c0_i32 = arith.constant 0 : i32
    %c0_i32_0 = arith.constant 0 : i32
    %c0_i32_1 = arith.constant 0 : i32
    return %c0_i32, %c0_i32_0 : i32, i32
  }
  func.func @transform_8(%arg0: i32) -> (i32, i32) {
    %c0_i32 = arith.constant 0 : i32
    %c0_i32_0 = arith.constant 0 : i32
    %c0_i32_1 = arith.constant 0 : i32
    return %c0_i32, %c0_i32_0 : i32, i32
  }
  func.func @transform_9(%arg0: i32) -> (i32, i32) {
    %c0_i32 = arith.constant 0 : i32
    %c0_i32_0 = arith.constant 0 : i32
    return %arg0, %c0_i32 : i32, i32
  }
  func.func @transform_10(%arg0: i32) -> (i32, i32) {
    %c0_i32 = arith.constant 0 : i32
    %c0_i32_0 = arith.constant 0 : i32
    return %arg0, %c0_i32 : i32, i32
  }
}

</mosaic_0001>

<bundles_post_ra>
// kernel: decoder_forward.1
= control target key start
LH: loop header
LB: loop body
LE: loop exit
PB: predicated region body
PF: predicated region fallthrough
CT: control target
= control target key end

     0   :  { %16 = vsyncpa [#allocation3], 0  ;;  %s2036_s0 = inlined_call_operand.vmem [shape: f32[8,4], index: 0, kind: input, shape index: {}]   ;;  %s2037_s1 = inlined_call_operand.vmem [shape: f32[8,128], index: 1, kind: input, shape index: {}, may-alias: {1,10}]   ;;  %s2038_s2 = inlined_call_operand.hbm [shape: f32[8,8,32], index: 2, kind: input, shape index: {}, may-alias: {2,3}]   ;;  %s2039_s3 = inlined_call_operand.hbm [shape: f32[64,32], index: 3, kind: input, shape index: {}, may-alias: {2,3}]   ;;  %s2040_s4 = inlined_call_operand.hbm [shape: f32[128,512], index: 4, kind: input, shape index: {}]   ;;  %s2041_s5 = inlined_call_operand.vmem [shape: f32[4,512], index: 5, kind: input, shape index: {}]   ;;  %s2042_s6 = inlined_call_operand.hbm [shape: f32[32,640], index: 6, kind: input, shape index: {}]   ;;  %s2043_s7 = inlined_call_operand.hbm [shape: f32[128,128], index: 7, kind: input, shape index: {}]   ;;  %s2044_s8 = inlined_call_operand.vmem [shape: f32[1,1152], index: 8, kind: input, shape index: {}]   ;;  %s2045_s9 = inlined_call_operand.vmem [shape: f32[8,128], index: 9, kind: output, shape index: {0}]   ;;  %s2046_s10 = inlined_call_operand.vmem [shape: f32[8,128], index: 10, kind: output, shape index: {1}, may-alias: {1,10}]  }
   0x1   :  { %17 = vsyncpa [#allocation5], 0 }
   0x2   :  { %18 = vsyncpa [#allocation8], 0  ;;  %s1738_s13 = smov [#allocation4]   ;;  %s1739_s15 = smov [#allocation7]  }
   0x3   :  { %s40_s14 = sshll.u32 %s1738_s13, 4  ;;  %s66_s16 = sshll.u32 %s1739_s15, 4  ;;  %s41_s14 = int_to_ptr.vmem [resolvable:$true] %s40_s14  ;;  %s1808_s16 = int_to_ptr.vmem [resolvable:$true] %s66_s16 }
   0x4   :  { %s1622_s19 = scalar_lea.hbm %s2039_s3, 1024 }
   0x5   :  { %p1623_p0 = scmp.ne.s32.totalorder %s2039_s3, %s1622_s19  ;;  %p1626_p1 = scmp.lt.u32.totalorder %s1622_s19, %s2039_s3 }
   0x7   :  { %p1628_p2 = pnand %p1626_p1, %p1623_p0 }
   0x9   :  { %1631 = shalt.err (!%p1628_p2)
}
   0xa   :  { %s1632_s24 = scalar_lea.vmem %s41_s14, 1024  ;;  %p1637_p4 = scmp.lt.s32.totalorder %s41_s14, %s41_s14 }
   0xb   :  { %p1633_p3 = scmp.ne.s32.totalorder %s41_s14, %s1632_s24  ;;  %p1638_p5 = scmp.lt.s32.totalorder %s1632_s24, %s1632_s24 }
   0xd   :  { %p1639_p6 = por %p1638_p5, %p1637_p4 }
   0xf   :  { %p1640_p7 = pnand %p1639_p6, %p1633_p3 }
  0x11   :  { %1643 = shalt.err (!%p1640_p7)
}
  0x12   :  { %s1740_s25 = smov 128   ;;  %s1741_s26 = smov 8  }
  0x13   :  { %46 = dma.hbm_to_vmem [thread:$0]  %s2039_s3, 1024, %s41_s14, [#allocation5], %s1740_s25, %s1740_s25, %s1741_s26  }
  0x14   :  { %s1644_s11 = scalar_lea.hbm %s2042_s6, 2560 }
  0x15   :  { %p1645_p8 = scmp.ne.s32.totalorder %s2042_s6, %s1644_s11  ;;  %p1648_p9 = scmp.lt.u32.totalorder %s1644_s11, %s2042_s6 }
  0x17   :  { %p1650_p10 = pnand %p1648_p9, %p1645_p8 }
  0x19   :  { %1653 = shalt.err (!%p1650_p10)
}
  0x1a   :  { %s1654_s18 = scalar_lea.vmem %s1808_s16, 2560  ;;  %p1659_p12 = scmp.lt.s32.totalorder %s1808_s16, %s1808_s16 }
  0x1b   :  { %p1655_p11 = scmp.ne.s32.totalorder %s1808_s16, %s1654_s18  ;;  %p1660_p13 = scmp.lt.s32.totalorder %s1654_s18, %s1654_s18 }
  0x1d   :  { %p1661_p0 = por %p1660_p13, %p1659_p12 }
  0x1f   :  { %p1662_p1 = pnand %p1661_p0, %p1655_p11 }
  0x21   :  { %1665 = shalt.err (!%p1662_p1)
}
  0x22   :  { %s1742_s3 = smov 640   ;;  %s1743_s14 = smov 40  }
  0x23   :  { %72 = dma.hbm_to_vmem [thread:$0]  %s2042_s6, 2560, %s1808_s16, [#allocation8], %s1742_s3, %s1742_s3, %s1743_s14  }
  0x24   :  { %s1744_s21 = smov [#allocation2]   ;;  %s1745_s23 = smov [#allocation6]  }
  0x25   :  { %s28_s22 = sshll.u32 %s1744_s21, 4  ;;  %s52_s24 = sshll.u32 %s1745_s23, 4  ;;  %s29_s22 = int_to_ptr.vmem [resolvable:$true] %s28_s22  ;;  %s1842_s24 = int_to_ptr.vmem [resolvable:$true] %s52_s24 }
  0x26   :  { %s1666_s29 = scalar_lea.hbm %s2038_s2, 1024 }
  0x27   :  { %p1667_p2 = scmp.ne.s32.totalorder %s2038_s2, %s1666_s29  ;;  %p1670_p3 = scmp.lt.u32.totalorder %s1666_s29, %s2038_s2 }
  0x29   :  { %p1672_p4 = pnand %p1670_p3, %p1667_p2 }
  0x2b   :  { %1675 = shalt.err (!%p1672_p4)
}
  0x2c   :  { %s1676_s6 = scalar_lea.vmem %s29_s22, 1024  ;;  %p1681_p6 = scmp.lt.s32.totalorder %s29_s22, %s29_s22 }
  0x2d   :  { %p1677_p5 = scmp.ne.s32.totalorder %s29_s22, %s1676_s6  ;;  %p1682_p7 = scmp.lt.s32.totalorder %s1676_s6, %s1676_s6 }
  0x2f   :  { %p1683_p8 = por %p1682_p7, %p1681_p6 }
  0x31   :  { %p1684_p9 = pnand %p1683_p8, %p1677_p5 }
  0x33   :  { %1687 = shalt.err (!%p1684_p9)
}
  0x34   :  { %34 = dma.hbm_to_vmem [thread:$0]  %s2038_s2, 1024, %s29_s22, [#allocation3], %s1740_s25, %s1740_s25, %s1741_s26  }
  0x35   :  { %s1688_s3 = scalar_lea.hbm %s2040_s4, 8192 }
  0x36   :  { %p1689_p10 = scmp.ne.s32.totalorder %s2040_s4, %s1688_s3  ;;  %p1692_p11 = scmp.lt.u32.totalorder %s1688_s3, %s2040_s4 }
  0x38   :  { %p1694_p12 = pnand %p1692_p11, %p1689_p10 }
  0x3a   :  { %1697 = shalt.err (!%p1694_p12)
}
  0x3b   :  { %s1698_s23 = scalar_lea.vmem %s1842_s24, 8192  ;;  %p1703_p0 = scmp.lt.s32.totalorder %s1842_s24, %s1842_s24 }
  0x3c   :  { %p1699_p13 = scmp.ne.s32.totalorder %s1842_s24, %s1698_s23  ;;  %p1704_p1 = scmp.lt.s32.totalorder %s1698_s23, %s1698_s23 }
  0x3e   :  { %p1705_p2 = por %p1704_p1, %p1703_p0 }
  0x40   :  { %p1706_p3 = pnand %p1705_p2, %p1699_p13 }
  0x42   :  { %1709 = shalt.err (!%p1706_p3)
}
  0x43   :  { %s1746_s2 = smov 512   ;;  %s1747_s22 = smov 32  }
  0x44   :  { %58 = dma.hbm_to_vmem [thread:$0]  %s2040_s4, 8192, %s1842_s24, [#allocation5], %s1746_s2, %s1746_s2, %s1747_s22  }
  0x45   :  { %s1748_s29 = smov [#allocation9]   ;;  %s1710_s13 = scalar_lea.hbm %s2043_s7, 2048 }
  0x46   :  { %s78_s30 = sshll.u32 %s1748_s29, 4  ;;  %p1711_p4 = scmp.ne.s32.totalorder %s2043_s7, %s1710_s13  ;;  %s79_s30 = int_to_ptr.vmem [resolvable:$true] %s78_s30 }
  0x47   :  { %p1714_p5 = scmp.lt.u32.totalorder %s1710_s13, %s2043_s7 }
  0x49   :  { %p1716_p6 = pnand %p1714_p5, %p1711_p4 }
  0x4b   :  { %1719 = shalt.err (!%p1716_p6)
}
  0x4c   :  { %s1720_s18 = scalar_lea.vmem %s79_s30, 2048  ;;  %p1725_p8 = scmp.lt.s32.totalorder %s79_s30, %s79_s30 }
  0x4d   :  { %p1721_p7 = scmp.ne.s32.totalorder %s79_s30, %s1720_s18  ;;  %p1726_p9 = scmp.lt.s32.totalorder %s1720_s18, %s1720_s18 }
  0x4f   :  { %p1727_p10 = por %p1726_p9, %p1725_p8 }
  0x51   :  { %p1728_p11 = pnand %p1727_p10, %p1721_p7 }
  0x53   :  { %1731 = shalt.err (!%p1728_p11)
}
  0x54   :  { %84 = dma.hbm_to_vmem [thread:$0]  %s2043_s7, 2048, %s79_s30, [#allocation8], %s1740_s25, %s1740_s25, %s1741_s26  }
  0x55   :  { %1732 = dma.done.wait [#allocation3], 1024  }
  0x56   :  { %1733 = vsyncadd [#allocation3], 4294966272 }
  0x57   :  { %1734 = dma.done.wait [#allocation5], 9216  }
  0x58   :  { %1735 = vsyncadd [#allocation5], 4294958080 }
  0x59   :  { %1736 = dma.done.wait [#allocation8], 4608  }
  0x5a   :  { %1737 = vsyncadd [#allocation8], 4294962688  ;;  %v1749_v0 = vmov 0.0   ;;  %v126_v1 = vld [vmem:[#allocation6 + $0x8] sm:$0xff]  ;;  %v125_v3 = vld [vmem:[#allocation6] sm:$0xff]  ;;  %vm360_vm0 = vcmask 1043456  }
  0x5b   :  { %253 = vmatprep.mubr.f32.mxu0 %v1749_v0  ;;  %324 = vmatprep.mubr.f32.mxu1 %v1749_v0  ;;  %v130_v2 = vld [vmem:[#allocation6 + $0x28] sm:$0xff]  ;;  %v129_v5 = vld [vmem:[#allocation6 + $0x20] sm:$0xff]  ;;  %v513_v55 = vld [vmem:[#allocation7 + $0x50] sm:$0xff]  ;;  %vm356_vm1 = vcmask 31744   ;;  %vm515_vm2 = vcmask 261120   ;;  %vm1019_vm3 = vcmask 1041409  }
  0x5c   :  { %v1432_v4 = vpack.c.bf16 %v130_v2, %v126_v1  ;;  %v134_v6 = vld [vmem:[#allocation6 + $0x48] sm:$0xff]  ;;  %v1434_v8 = vpack.c.bf16 %v129_v5, %v125_v3  ;;  %v133_v10 = vld [vmem:[#allocation6 + $0x40] sm:$0xff]  ;;  %v514_v56 = vld [vmem:[#allocation7 + $0x78] sm:$0xff]  ;;  %v1750_v5 = vmov 1966171168   ;;  %vm1021_vm4 = vcmask 1042434  }
  0x5d   :  { %v138_v7 = vld [vmem:[#allocation6 + $0x68] sm:$0xff]  ;;  %v137_v11 = vld [vmem:[#allocation6 + $0x60] sm:$0xff]  ;;  %v1500_v58 = vpack.c.bf16 %v514_v56, %v513_v55  ;;  %v114_v61 = vld [vmem:[#allocation4 + $0x10] sm:$0xff]  ;;  %vm1023_vm5 = vcmask 1043459   ;;  %vm1025_vm6 = vcmask 1044484   ;;  %vm1027_vm7 = vcmask 1045509  }
  0x5e   :  { %v1436_v9 = vpack.c.bf16 %v138_v7, %v134_v6  ;;  %v142_v12 = vld [vmem:[#allocation6 + $0x88] sm:$0xff]  ;;  %1433 = vmatprep.subr.bf16.mxu0 %v1432_v4  ;;  %v1438_v14 = vpack.c.bf16 %v137_v11, %v133_v10  ;;  %v141_v16 = vld [vmem:[#allocation6 + $0x80] sm:$0xff]  ;;  %v115_v62 = vld [vmem:[#allocation4 + $0x18] sm:$0xff]  ;;  %v332_v4 = vlaneseq  ;;  %v648_v6 = vunpack.c.l.s4 %v1750_v5 }
  0x5f   :  { %v146_v13 = vld [vmem:[#allocation6 + $0xa8] sm:$0xff]  ;;  %1435 = vmatpush1.bf16.msra.mxu0 %v1434_v8  ;;  %v145_v17 = vld [vmem:[#allocation6 + $0xa0] sm:$0xff]  ;;  %v118_v2 = vld [vmem:[#allocation4 + $0x30] sm:$0xff]  ;;  %vm1029_vm8 = vcmask 1046534   ;;  %vm1031_vm9 = vcmask 1047559   ;;  %vm1752_vm10 = vmmov 0  }
  0x60   :  { %1437 = vmatprep.subr.bf16.mxu0 %v1436_v9  ;;  %v1440_v15 = vpack.c.bf16 %v146_v13, %v142_v12  ;;  %v150_v18 = vld [vmem:[#allocation6 + $0xc8] sm:$0xff]  ;;  %v1442_v20 = vpack.c.bf16 %v145_v17, %v141_v16  ;;  %v149_v22 = vld [vmem:[#allocation6 + $0xc0] sm:$0xff]  ;;  %v119_v3 = vld [vmem:[#allocation4 + $0x38] sm:$0xff]  ;;  %v1921_v7 = vshrl.u32 %v332_v4, 7  ;;  %v649_v8 = vunpack.c.0.s8 %v648_v6 }
  0x61   :  { %v154_v19 = vld [vmem:[#allocation6 + $0xe8] sm:$0xff]  ;;  %v153_v23 = vld [vmem:[#allocation6 + $0xe0] sm:$0xff] }
  0x62   :  { %v1444_v21 = vpack.c.bf16 %v154_v19, %v150_v18  ;;  %v158_v24 = vld [vmem:[#allocation6 + $0x108] sm:$0xff]  ;;  %v1446_v26 = vpack.c.bf16 %v153_v23, %v149_v22  ;;  %v157_v28 = vld [vmem:[#allocation6 + $0x100] sm:$0xff]  ;;  %v652_v9 = vsub.s32 %v649_v8, %v1921_v7  ;;  %v1927_v18 = vsub.s32 0, %v1921_v7 }
  0x63   :  { %1439 = vmatpush1.bf16.msra.mxu0 %v1438_v14  ;;  %v162_v25 = vld [vmem:[#allocation6 + $0x128] sm:$0xff]  ;;  %v161_v29 = vld [vmem:[#allocation6 + $0x120] sm:$0xff] }
  0x64   :  { %1441 = vmatprep.subr.bf16.mxu0 %v1440_v15  ;;  %v1448_v27 = vpack.c.bf16 %v162_v25, %v158_v24  ;;  %v166_v30 = vld [vmem:[#allocation6 + $0x148] sm:$0xff]  ;;  %v1450_v32 = vpack.c.bf16 %v161_v29, %v157_v28  ;;  %v165_v34 = vld [vmem:[#allocation6 + $0x140] sm:$0xff] }
  0x65   :  { %v170_v31 = vld [vmem:[#allocation6 + $0x168] sm:$0xff]  ;;  %v169_v35 = vld [vmem:[#allocation6 + $0x160] sm:$0xff] }
  0x66   :  { %v1452_v33 = vpack.c.bf16 %v170_v31, %v166_v30  ;;  %v174_v36 = vld [vmem:[#allocation6 + $0x188] sm:$0xff]  ;;  %v1454_v38 = vpack.c.bf16 %v169_v35, %v165_v34  ;;  %v173_v40 = vld [vmem:[#allocation6 + $0x180] sm:$0xff] }
  0x67   :  { %1443 = vmatpush1.bf16.msra.mxu0 %v1442_v20  ;;  %v178_v37 = vld [vmem:[#allocation6 + $0x1a8] sm:$0xff]  ;;  %v177_v41 = vld [vmem:[#allocation6 + $0x1a0] sm:$0xff] }
  0x68   :  { %1445 = vmatprep.subr.bf16.mxu0 %v1444_v21  ;;  %v1456_v39 = vpack.c.bf16 %v178_v37, %v174_v36  ;;  %v182_v42 = vld [vmem:[#allocation6 + $0x1c8] sm:$0xff]  ;;  %v1458_v44 = vpack.c.bf16 %v177_v41, %v173_v40  ;;  %v181_v46 = vld [vmem:[#allocation6 + $0x1c0] sm:$0xff] }
  0x69   :  { %v186_v43 = vld [vmem:[#allocation6 + $0x1e8] sm:$0xff]  ;;  %v185_v47 = vld [vmem:[#allocation6 + $0x1e0] sm:$0xff] }
  0x6a   :  { %v1460_v45 = vpack.c.bf16 %v186_v43, %v182_v42  ;;  %v350_v48 = vld [vmem:[%s2041_s5] sm:$0xff]  ;;  %v1462_v49 = vpack.c.bf16 %v185_v47, %v181_v46  ;;  %v512_v52 = vld [vmem:[#allocation7 + $0x28] sm:$0xff] }
  0x6b   :  { %1447 = vmatpush1.bf16.msra.mxu0 %v1446_v26  ;;  %v354_v50 = vcombine.high %v350_v48, %v350_v48  ;;  %v511_v51 = vld [vmem:[#allocation7] sm:$0xff]  ;;  %v113_v60 = vld [vmem:[#allocation4 + $0x8] sm:$0xff] }
  0x6c   :  { %1449 = vmatprep.subr.bf16.mxu0 %v1448_v27  ;;  %v1899_v53 = vld [vmem:[%s2037_s1] sm:$0xff]  ;;  %v1496_v54 = vpack.c.bf16 %v512_v52, %v511_v51  ;;  %v117_v1 = vld [vmem:[#allocation4 + $0x28] sm:$0xff] }
  0x6d   :  { %v1908_v57 = vld [vmem:[%s2036_s0] sm:$0xff] }
  0x6e   :  { %v112_v59 = vld [vmem:[#allocation4] sm:$0xff] }
  0x6f   :  { %1451 = vmatpush1.bf16.msra.mxu0 %v1450_v32  ;;  %v116_v63 = vld [vmem:[#allocation4 + $0x20] sm:$0xff] }
  0x70   :  { %1453 = vmatprep.subr.bf16.mxu0 %v1452_v33  ;;  %v1341_v22 = vld [vmem:[%s2044_s8] ss:$0 sm:$0xff] }
  0x73   :  { %1455 = vmatpush1.bf16.msra.mxu0 %v1454_v38 }
  0x74   :  { %1457 = vmatprep.subr.bf16.mxu0 %v1456_v39 }
  0x77   :  { %1459 = vmatpush1.bf16.msra.mxu0 %v1458_v44 }
  0x78   :  { %1461 = vmatprep.subr.bf16.mxu0 %v1460_v45 }
  0x7b   :  { %1463 = vmatpush1.bf16.msra.mxu0 %v1462_v49 }
  0x7c   :  { %1327 = vmatprep.subr.msk.mxu0 %vm360_vm0, %v354_v50 }
  0x7e   :  { %254 = vmatmul.mubr.f32.vlgmr.msra.gmra.mrb[0].mxu0 %v1899_v53 }
  0x7f   :  { %1328 = vmatpush1.msk.msra.mxu0 %vm360_vm0, %v350_v48  ;;  %433 = vmatprep.mubr.f32.mxu0 %v1749_v0 }
  0x80   :  { %1497 = vmatprep.subr.bf16.mxu0 %v1496_v54 }
  0x82   :  { %1329 = vmatmul.mubr.msk.f32.vlgmr.msra.gmra.mrb[2].mxu0 %vm356_vm1, %v1908_v57 }
  0x83   :  { %1499 = vmatpush3.bf16.msra.mxu0 %v1496_v54  ;;  %1385 = vmatprep.mubr.msk.f32.mxu0 %vm515_vm2, %v112_v59 }
  0x84   :  { %1501 = vmatprep.subr.bf16.mxu0 %v1500_v58 }
  0x87   :  { %1503 = vmatpush3.bf16.msra.mxu0 %v1500_v58  ;;  %v1342_v58 = vld [vmem:[%s2044_s8 + $0x1] ss:$0 sm:$0xff] }
  0x8a   :  { %1386 = vmatmul.mubr.msk.f32.vlgmr.msra.gmra.mrb[4].mxu0 %vm515_vm2, %v113_v60 }
  0x8b   :  { %1388 = vmatprep.mubr.msk.f32.mxu0 %vm515_vm2, %v114_v61 }
  0x8e   :  { %1389 = vmatmul.mubr.msk.f32.gmra.mrb[6].mxu0 %vm515_vm2, %v115_v62 }
  0x8f   :  { %1391 = vmatprep.mubr.msk.f32.mxu0 %vm515_vm2, %v116_v63 }
  0x92   :  { %1392 = vmatmul.mubr.msk.f32.gmra.mrb[8].mxu0 %vm515_vm2, %v117_v1 }
  0x93   :  { %1394 = vmatprep.mubr.msk.f32.mxu0 %vm515_vm2, %v118_v2 }
  0x96   :  { %1395 = vmatmul.mubr.msk.f32.gmra.mrb[10].mxu0 %vm515_vm2, %v119_v3 }
  0x97   :  { %1099 = vmatprep.mubr.f32.mxu0 %v1749_v0 }
 0x151   :  { %v255_v10 = vpop.f32.mrb[0].mxu0 }
 0x152   :  { %v653_v11 = vrot.slane %v255_v10, %v652_v9  ;;  %v1924_v12 = vpop.f32.mrb[1].mxu0  ;;  %v646_v13 = vcombine.high %v255_v10, %v255_v10 }
 0x154   :  { %v661_v14 = vcombine.high %v653_v11, %v653_v11  ;;  %v660_v15 = vrot.slane %v646_v13, %v652_v9  ;;  %v669_v17 = vrot.slane %v653_v11, %v652_v9 }
 0x156   :  { %v683_v16 = vrot.slane %v661_v14, %v652_v9  ;;  %v662_v19 = vcombine.high %v660_v15, %v660_v15  ;;  %v698_v24 = vrot.slane %v669_v17, %v1927_v18  ;;  %v691_v25 = vcombine.high %v669_v17, %v669_v17  ;;  %v128_v17 = vld [vmem:[#allocation6 + $0x18] sm:$0xff] }
 0x157   :  { %v676_v35 = vrot.slane %v660_v15, %v652_v9 }
 0x158   :  { %v702_v20 = vrot.slane %v683_v16, %v1927_v18  ;;  %v693_v21 = vcombine.high %v683_v16, %v683_v16  ;;  %v690_v31 = vrot.slane %v662_v19, %v652_v9  ;;  %v706_v34 = vrot.slane %v691_v25, %v1927_v18  ;;  %v132_v19 = vld [vmem:[#allocation6 + $0x38] sm:$0xff] }
 0x159   :  { %v714_v44 = vrot.slane %v676_v35, %v1927_v18  ;;  %v692_v45 = vcombine.high %v676_v35, %v676_v35  ;;  %v140_v25 = vld [vmem:[#allocation6 + $0x78] sm:$0xff] }
 0x15a   :  { %v710_v30 = vrot.slane %v693_v21, %v1927_v18  ;;  %v718_v40 = vrot.slane %v690_v31, %v1927_v18  ;;  %v694_v41 = vcombine.high %v690_v31, %v690_v31  ;;  %v127_v21 = vld [vmem:[#allocation6 + $0x10] sm:$0xff]  ;;  %v148_v31 = vld [vmem:[#allocation6 + $0xb8] sm:$0xff] }
 0x15b   :  { %v722_v54 = vrot.slane %v692_v45, %v1927_v18  ;;  %v152_v35 = vld [vmem:[#allocation6 + $0xd8] sm:$0xff] }
 0x15c   :  { %v726_v50 = vrot.slane %v694_v41, %v1927_v18  ;;  %v155_v41 = vld [vmem:[#allocation6 + $0xf0] sm:$0xff]  ;;  %v164_v45 = vld [vmem:[#allocation6 + $0x138] sm:$0xff] }
 0x15d   :  { %v1387_v23 = vpop.f32.mrb[4].mxu0 }
 0x15e   :  { %v736_v26 = vadd.f32 %v1387_v23, %v702_v20  ;;  %v606_v27 = vpop.f32.mrb[5].mxu0  ;;  %v1464_v20 = vpack.c.bf16 %v132_v19, %v128_v17 }
 0x15f   :  { %v735_v28 = vadd.f32 %v698_v24, %v606_v27  ;;  %v136_v24 = vld [vmem:[#allocation6 + $0x58] sm:$0xff]  ;;  %v135_v27 = vld [vmem:[#allocation6 + $0x50] sm:$0xff] }
 0x160   :  { %v750_v29 = vadd.f32 %v1341_v22, %v736_v26  ;;  %1465 = vmatprep.subr.bf16.mxu1 %v1464_v20  ;;  %v1468_v26 = vpack.c.bf16 %v140_v25, %v136_v24  ;;  %v183_v20 = vld [vmem:[#allocation6 + $0x1d0] sm:$0xff] }
 0x161   :  { %v749_v32 = vadd.f32 %v1341_v22, %v735_v28  ;;  %v1390_v33 = vpop.f32.mrb[6].mxu0  ;;  %v139_v28 = vld [vmem:[#allocation6 + $0x70] sm:$0xff] }
 0x162   :  { %1563 = vtanh.f32 %v750_v29  ;;  %v738_v36 = vadd.f32 %v1390_v33, %v710_v30  ;;  %v616_v37 = vpop.f32.mrb[7].mxu0  ;;  %v1470_v29 = vpack.c.bf16 %v139_v28, %v135_v27  ;;  %v144_v30 = vld [vmem:[#allocation6 + $0x98] sm:$0xff] }
 0x163   :  { %v737_v38 = vadd.f32 %v706_v34, %v616_v37  ;;  %1565 = vtanh.f32 %v749_v32  ;;  %v143_v32 = vld [vmem:[#allocation6 + $0x90] sm:$0xff]  ;;  %v1472_v33 = vpack.c.bf16 %v148_v31, %v144_v30 }
 0x164   :  { %v752_v39 = vadd.f32 %v1341_v22, %v738_v36  ;;  %v147_v34 = vld [vmem:[#allocation6 + $0xb0] sm:$0xff]  ;;  %v156_v36 = vld [vmem:[#allocation6 + $0xf8] sm:$0xff] }
 0x165   :  { %v751_v42 = vadd.f32 %v1341_v22, %v737_v38  ;;  %v1393_v43 = vpop.f32.mrb[8].mxu0  ;;  %v1474_v37 = vpack.c.bf16 %v147_v34, %v143_v32  ;;  %v151_v38 = vld [vmem:[#allocation6 + $0xd0] sm:$0xff] }
 0x166   :  { %1567 = vtanh.f32 %v752_v39  ;;  %v740_v46 = vadd.f32 %v1393_v43, %v718_v40  ;;  %v626_v47 = vpop.f32.mrb[9].mxu0  ;;  %v996_v39 = vld [vmem:[#allocation7 + $0x10] sm:$0xff]  ;;  %v1476_v40 = vpack.c.bf16 %v156_v36, %v152_v35  ;;  %v160_v43 = vld [vmem:[#allocation6 + $0x118] sm:$0xff] }
 0x167   :  { %v739_v48 = vadd.f32 %v714_v44, %v626_v47  ;;  %1569 = vtanh.f32 %v751_v42  ;;  %v1000_v42 = vld [vmem:[#allocation7 + $0x38] sm:$0xff]  ;;  %v999_v47 = vld [vmem:[#allocation7 + $0x30] sm:$0xff] }
 0x168   :  { %v754_v49 = vadd.f32 %v1341_v22, %v740_v46  ;;  %v1504_v44 = vpack.c.bf16 %v1000_v42, %v996_v39  ;;  %v995_v46 = vld [vmem:[#allocation7 + $0x8] sm:$0xff] }
 0x169   :  { %v753_v51 = vadd.f32 %v1341_v22, %v739_v48  ;;  %v1396_v52 = vpop.f32.mrb[10].mxu0  ;;  %v1506_v48 = vpack.c.bf16 %v999_v47, %v995_v46 }
 0x16a   :  { %v742_v55 = vadd.f32 %v1396_v52, %v726_v50  ;;  %v636_v56 = vpop.f32.mrb[11].mxu0  ;;  %1505 = vmatprep.subr.bf16.mxu0 %v1504_v44  ;;  %v159_v50 = vld [vmem:[#allocation6 + $0x110] sm:$0xff]  ;;  %v1480_v52 = vpack.c.bf16 %v164_v45, %v160_v43 }
 0x16b   :  { %1571 = vtanh.f32 %v753_v51  ;;  %v741_v59 = vadd.f32 %v722_v54, %v636_v56  ;;  %v1004_v51 = vld [vmem:[#allocation7 + $0x60] sm:$0xff]  ;;  %1507 = vmatpush1.bf16.msra.mxu0 %v1506_v48  ;;  %v163_v54 = vld [vmem:[#allocation6 + $0x130] sm:$0xff]  ;;  %v1008_v56 = vld [vmem:[#allocation7 + $0x88] sm:$0xff] }
 0x16c   :  { %v1564_v60 = vpop.eup %1563  ;;  %1573 = vtanh.f32 %v754_v49  ;;  %v756_v61 = vadd.f32 %v1341_v22, %v742_v55  ;;  %v1478_v49 = vpack.c.bf16 %v155_v41, %v151_v38  ;;  %v168_v55 = vld [vmem:[#allocation6 + $0x158] sm:$0xff] }
 0x16d   :  { %v755_v62 = vadd.f32 %v1341_v22, %v741_v59  ;;  %v772_v63 = vmul.f32 %v1564_v60, %v1342_v58  ;;  %v1566_v1 = vpop.eup %1565  ;;  %v131_v22 = vld [vmem:[#allocation6 + $0x30] sm:$0xff]  ;;  %v1508_v59 = vpack.c.bf16 %v1008_v56, %v1004_v51  ;;  %v1003_v60 = vld [vmem:[#allocation7 + $0x58] sm:$0xff] }
 0x16e   :  { %v771_v3 = vmul.f32 %v1566_v1, %v1342_v58  ;;  %v1466_v23 = vpack.c.bf16 %v131_v22, %v127_v21  ;;  %v998_v1 = vld [vmem:[#allocation7 + $0x20] sm:$0xff]  ;;  %v187_v21 = vld [vmem:[#allocation6 + $0x1f0] sm:$0xff] }
 0x16f   :  { %1575 = vtanh.f32 %v755_v62  ;;  %781 = vadd.xlane.f32.xlu0 %v772_v63  ;;  %v1482_v63 = vpack.c.bf16 %v163_v54, %v159_v50  ;;  %1509 = vmatprep.subr.bf16.mxu0 %v1508_v59  ;;  %v1494_v22 = vpack.c.bf16 %v187_v21, %v183_v20 }
 0x170   :  { %v1568_v2 = vpop.eup %1567  ;;  %1577 = vtanh.f32 %v756_v61  ;;  %1467 = vmatpush1.bf16.msra.mxu1 %v1466_v23  ;;  %v1007_v61 = vld [vmem:[#allocation7 + $0x80] sm:$0xff]  ;;  %v351_v23 = vld [vmem:[%s2041_s5 + $0x8] sm:$0xff] }
 0x171   :  { %v774_v4 = vmul.f32 %v1568_v2, %v1342_v58  ;;  %v1570_v5 = vpop.eup %1569  ;;  %1469 = vmatprep.subr.bf16.mxu1 %v1468_v26  ;;  %v1510_v62 = vpack.c.bf16 %v1007_v61, %v1003_v60  ;;  %v355_v24 = vcombine.high %v351_v23, %v351_v23 }
 0x172   :  { %v773_v8 = vmul.f32 %v1570_v5, %v1342_v58  ;;  %v1002_v5 = vld [vmem:[#allocation7 + $0x48] sm:$0xff] }
 0x173   :  { %779 = vadd.xlane.f32.xlu0 %v771_v3  ;;  %785 = vadd.xlane.f32.xlu1 %v774_v4  ;;  %v167_v3 = vld [vmem:[#allocation6 + $0x150] sm:$0xff] }
 0x174   :  { %1471 = vmatpush1.bf16.msra.mxu1 %v1470_v29  ;;  %v171_v4 = vld [vmem:[#allocation6 + $0x170] sm:$0xff]  ;;  %1511 = vmatpush1.bf16.msra.mxu0 %v1510_v62 }
 0x175   :  { %v1572_v6 = vpop.eup %1571  ;;  %1473 = vmatprep.subr.bf16.mxu1 %v1472_v33 }
 0x176   :  { %v1574_v9 = vpop.eup %1573  ;;  %v775_v10 = vmul.f32 %v1572_v6, %v1342_v58  ;;  %v176_v6 = vld [vmem:[#allocation6 + $0x198] sm:$0xff] }
 0x177   :  { %783 = vadd.xlane.f32.xlu1 %v773_v8  ;;  %v776_v13 = vmul.f32 %v1574_v9, %v1342_v58  ;;  %v180_v8 = vld [vmem:[#allocation6 + $0x1b8] sm:$0xff]  ;;  %v1512_v9 = vpack.c.bf16 %v1002_v5, %v998_v1 }
 0x178   :  { %787 = vadd.xlane.f32.xlu0 %v775_v10  ;;  %1475 = vmatpush1.bf16.msra.mxu1 %v1474_v37  ;;  %v1486_v10 = vpack.c.bf16 %v171_v4, %v167_v3 }
 0x179   :  { %v1576_v11 = vpop.eup %1575  ;;  %1477 = vmatprep.subr.bf16.mxu1 %v1476_v40  ;;  %1513 = vmatprep.subr.bf16.mxu0 %v1512_v9 }
 0x17a   :  { %v1578_v14 = vpop.eup %1577  ;;  %v777_v15 = vmul.f32 %v1576_v11, %v1342_v58  ;;  %v1488_v11 = vpack.c.bf16 %v180_v8, %v176_v6 }
 0x17b   :  { %789 = vadd.xlane.f32.xlu1 %v776_v13  ;;  %v778_v16 = vmul.f32 %v1578_v14, %v1342_v58  ;;  %v172_v58 = vld [vmem:[#allocation6 + $0x178] sm:$0xff]  ;;  %v175_v13 = vld [vmem:[#allocation6 + $0x190] sm:$0xff] }
 0x17c   :  { %791 = vadd.xlane.f32.xlu0 %v777_v15  ;;  %1479 = vmatpush1.bf16.msra.mxu1 %v1478_v49  ;;  %v1484_v2 = vpack.c.bf16 %v172_v58, %v168_v55  ;;  %v179_v14 = vld [vmem:[#allocation6 + $0x1b0] sm:$0xff]  ;;  %v184_v15 = vld [vmem:[#allocation6 + $0x1d8] sm:$0xff] }
 0x17d   :  { %1481 = vmatprep.subr.bf16.mxu1 %v1480_v52  ;;  %v1490_v17 = vpack.c.bf16 %v179_v14, %v175_v13 }
 0x17f   :  { %793 = vadd.xlane.f32.xlu1 %v778_v16  ;;  %v188_v16 = vld [vmem:[#allocation6 + $0x1f8] sm:$0xff] }
 0x180   :  { %1483 = vmatpush1.bf16.msra.mxu1 %v1482_v63  ;;  %v1492_v19 = vpack.c.bf16 %v188_v16, %v184_v15 }
 0x181   :  { %1485 = vmatprep.subr.bf16.mxu1 %v1484_v2 }
 0x184   :  { %1487 = vmatpush1.bf16.msra.mxu1 %v1486_v10 }
 0x185   :  { %1489 = vmatprep.subr.bf16.mxu1 %v1488_v11 }
 0x188   :  { %1491 = vmatpush1.bf16.msra.mxu1 %v1490_v17 }
 0x189   :  { %1493 = vmatprep.subr.bf16.mxu1 %v1492_v19 }
 0x18c   :  { %1495 = vmatpush1.bf16.msra.mxu1 %v1494_v22 }
 0x18d   :  { %1330 = vmatprep.subr.msk.mxu1 %vm360_vm0, %v355_v24 }
 0x18f   :  { %325 = vmatmul.mubr.f32.vlgmr.msra.gmra.mrb[0].mxu1 %v1899_v53 }
 0x190   :  { %504 = vmatprep.mubr.f32.mxu1 %v1749_v0  ;;  %1331 = vmatpush1.msk.msra.mxu1 %vm360_vm0, %v351_v23 }
 0x193   :  { %1332 = vmatmul.mubr.msk.f32.vlgmr.msra.gmra.mrb[2].mxu1 %vm356_vm1, %v1908_v57 }
 0x194   :  { %1429 = vmatprep.mubr.msk.f32.mxu1 %vm1752_vm10, %v1749_v0 }
 0x1fc   :  { %v782_v25 = vpop.xlane.xlu0 %781 }
 0x1fd   :  { %v801_v26 = vrot.slane %v782_v25, 4 }
 0x1ff   :  { %v802_v27 = vmax.f32 %v782_v25, %v801_v26 }
 0x200   :  { %v780_v28 = vpop.xlane.xlu0 %779  ;;  %v786_v29 = vpop.xlane.xlu1 %785 }
 0x201   :  { %v803_v53 = vrot.slane %v802_v27, 2  ;;  %v795_v30 = vrot.slane %v780_v28, 4  ;;  %v813_v31 = vrot.slane %v786_v29, 4 }
 0x203   :  { %v804_v32 = vmax.f32 %v802_v27, %v803_v53  ;;  %v796_v33 = vmax.f32 %v780_v28, %v795_v30  ;;  %v814_v34 = vmax.f32 %v786_v29, %v813_v31 }
 0x204   :  { %v784_v35 = vpop.xlane.xlu1 %783 }
 0x205   :  { %v805_v36 = vrot.slane %v804_v32, 1  ;;  %v797_v37 = vrot.slane %v796_v33, 2  ;;  %v815_v38 = vrot.slane %v814_v34, 2  ;;  %v807_v39 = vrot.slane %v784_v35, 4  ;;  %v788_v40 = vpop.xlane.xlu0 %787 }
 0x206   :  { %v819_v41 = vrot.slane %v788_v40, 4 }
 0x207   :  { %v806_v42 = vmax.f32 %v804_v32, %v805_v36  ;;  %v798_v57 = vmax.f32 %v796_v33, %v797_v37  ;;  %v816_v43 = vmax.f32 %v814_v34, %v815_v38  ;;  %v808_v44 = vmax.f32 %v784_v35, %v807_v39 }
 0x208   :  { %v820_v45 = vmax.f32 %v788_v40, %v819_v41  ;;  %v790_v46 = vpop.xlane.xlu1 %789 }
 0x209   :  { %v844_v47 = vsub.f32 %v782_v25, %v806_v42  ;;  %v799_v48 = vrot.slane %v798_v57, 1  ;;  %v817_v49 = vrot.slane %v816_v43, 1  ;;  %v809_v50 = vrot.slane %v808_v44, 2  ;;  %v792_v51 = vpop.xlane.xlu0 %791 }
 0x20a   :  { %v821_v52 = vrot.slane %v820_v45, 2  ;;  %v825_v54 = vrot.slane %v790_v46, 4  ;;  %v831_v55 = vrot.slane %v792_v51, 4 }
 0x20b   :  { %v853_v56 = vmul.f32 1.442695, %v844_v47  ;;  %v800_v58 = vmax.f32 %v798_v57, %v799_v48  ;;  %v818_v59 = vmax.f32 %v816_v43, %v817_v49  ;;  %v810_v60 = vmax.f32 %v808_v44, %v809_v50 }
 0x20c   :  { %v822_v61 = vmax.f32 %v820_v45, %v821_v52  ;;  %v826_v62 = vmax.f32 %v790_v46, %v825_v54  ;;  %v832_v63 = vmax.f32 %v792_v51, %v831_v55  ;;  %v794_v1 = vpop.xlane.xlu1 %793 }
 0x20d   :  { %1579 = vpow2.f32 %v853_v56  ;;  %v843_v2 = vsub.f32 %v780_v28, %v800_v58  ;;  %v846_v3 = vsub.f32 %v786_v29, %v818_v59  ;;  %v811_v4 = vrot.slane %v810_v60, 1 }
 0x20e   :  { %v823_v5 = vrot.slane %v822_v61, 1  ;;  %v827_v6 = vrot.slane %v826_v62, 2  ;;  %v833_v8 = vrot.slane %v832_v63, 2  ;;  %v837_v9 = vrot.slane %v794_v1, 4 }
 0x20f   :  { %v851_v10 = vmul.f32 1.442695, %v843_v2  ;;  %v857_v11 = vmul.f32 1.442695, %v846_v3  ;;  %v812_v13 = vmax.f32 %v810_v60, %v811_v4 }
 0x210   :  { %v824_v14 = vmax.f32 %v822_v61, %v823_v5  ;;  %v828_v15 = vmax.f32 %v826_v62, %v827_v6  ;;  %v834_v16 = vmax.f32 %v832_v63, %v833_v8  ;;  %v838_v17 = vmax.f32 %v794_v1, %v837_v9 }
 0x211   :  { %1581 = vpow2.f32 %v851_v10  ;;  %v845_v19 = vsub.f32 %v784_v35, %v812_v13 }
 0x212   :  { %1583 = vpow2.f32 %v857_v11  ;;  %v847_v20 = vsub.f32 %v788_v40, %v824_v14  ;;  %v829_v21 = vrot.slane %v828_v15, 1  ;;  %v835_v22 = vrot.slane %v834_v16, 1 }
 0x213   :  { %v855_v23 = vmul.f32 1.442695, %v845_v19  ;;  %v839_v24 = vrot.slane %v838_v17, 2 }
 0x214   :  { %v859_v25 = vmul.f32 1.442695, %v847_v20  ;;  %v830_v26 = vmax.f32 %v828_v15, %v829_v21  ;;  %v836_v27 = vmax.f32 %v834_v16, %v835_v22 }
 0x215   :  { %1585 = vpow2.f32 %v855_v23  ;;  %v840_v28 = vmax.f32 %v838_v17, %v839_v24 }
 0x216   :  { %1587 = vpow2.f32 %v859_v25  ;;  %v848_v29 = vsub.f32 %v790_v46, %v830_v26  ;;  %v849_v53 = vsub.f32 %v792_v51, %v836_v27  ;;  %v105_v27 = vld [vmem:[#allocation2 + $0x8] sm:$0xff] }
 0x217   :  { %v1952_v30 = vpop.eup %1579  ;;  %v841_v31 = vrot.slane %v840_v28, 1 }
 0x218   :  { %v873_v32 = vrot.slane %v1952_v30, 4  ;;  %v861_v33 = vmul.f32 1.442695, %v848_v29  ;;  %v863_v34 = vmul.f32 1.442695, %v849_v53 }
 0x219   :  { %v842_v35 = vmax.f32 %v840_v28, %v841_v31 }
 0x21a   :  { %v874_v36 = vadd.f32 %v1952_v30, %v873_v32  ;;  %1589 = vpow2.f32 %v861_v33 }
 0x21b   :  { %v1956_v37 = vpop.eup %1581  ;;  %1591 = vpow2.f32 %v863_v34  ;;  %v850_v38 = vsub.f32 %v794_v1, %v842_v35 }
 0x21c   :  { %v1958_v39 = vpop.eup %1583  ;;  %v875_v40 = vrot.slane %v874_v36, 2  ;;  %v867_v41 = vrot.slane %v1956_v37, 4 }
 0x21d   :  { %v885_v42 = vrot.slane %v1958_v39, 4  ;;  %v865_v57 = vmul.f32 1.442695, %v850_v38 }
 0x21e   :  { %v876_v43 = vadd.f32 %v875_v40, %v874_v36  ;;  %v868_v44 = vadd.f32 %v1956_v37, %v867_v41  ;;  %v104_v36 = vld [vmem:[#allocation2] sm:$0xff] }
 0x21f   :  { %v1963_v45 = vpop.eup %1585  ;;  %v886_v46 = vadd.f32 %v1958_v39, %v885_v42  ;;  %1593 = vpow2.f32 %v865_v57  ;;  %v107_v42 = vld [vmem:[#allocation2 + $0x18] sm:$0xff] }
 0x220   :  { %v1966_v47 = vpop.eup %1587  ;;  %v877_v48 = vrot.slane %v876_v43, 1  ;;  %v869_v49 = vrot.slane %v868_v44, 2  ;;  %v879_v50 = vrot.slane %v1963_v45, 4 }
 0x221   :  { %v887_v51 = vrot.slane %v886_v46, 2  ;;  %v891_v52 = vrot.slane %v1966_v47, 4 }
 0x222   :  { %v878_v54 = vadd.f32 %v877_v48, %v876_v43  ;;  %v870_v55 = vadd.f32 %v869_v49, %v868_v44  ;;  %v880_v56 = vadd.f32 %v1963_v45, %v879_v50  ;;  %v106_v49 = vld [vmem:[#allocation2 + $0x10] sm:$0xff] }
 0x223   :  { %v888_v58 = vadd.f32 %v887_v51, %v886_v46  ;;  %v892_v59 = vadd.f32 %v1966_v47, %v891_v52 }
 0x224   :  { %v1972_v60 = vpop.eup %1589  ;;  %1595 = vrcp.f32 %v878_v54  ;;  %v871_v61 = vrot.slane %v870_v55, 1  ;;  %v881_v62 = vrot.slane %v880_v56, 2 }
 0x225   :  { %v1974_v63 = vpop.eup %1591  ;;  %v889_v1 = vrot.slane %v888_v58, 1  ;;  %v893_v2 = vrot.slane %v892_v59, 2  ;;  %v897_v3 = vrot.slane %v1972_v60, 4 }
 0x226   :  { %v872_v4 = vadd.f32 %v871_v61, %v870_v55  ;;  %v882_v5 = vadd.f32 %v881_v62, %v880_v56  ;;  %v903_v6 = vrot.slane %v1974_v63, 4  ;;  %v108_v55 = vld [vmem:[#allocation2 + $0x20] sm:$0xff] }
 0x227   :  { %v890_v8 = vadd.f32 %v889_v1, %v888_v58  ;;  %v894_v9 = vadd.f32 %v893_v2, %v892_v59  ;;  %v898_v10 = vadd.f32 %v1972_v60, %v897_v3 }
 0x228   :  { %1597 = vrcp.f32 %v872_v4  ;;  %v883_v11 = vrot.slane %v882_v5, 1  ;;  %v904_v13 = vadd.f32 %v1974_v63, %v903_v6  ;;  %v109_v4 = vld [vmem:[#allocation2 + $0x28] sm:$0xff] }
 0x229   :  { %v1980_v14 = vpop.eup %1593  ;;  %1599 = vrcp.f32 %v890_v8  ;;  %v895_v15 = vrot.slane %v894_v9, 1  ;;  %v899_v16 = vrot.slane %v898_v10, 2 }
 0x22a   :  { %v884_v17 = vadd.f32 %v883_v11, %v882_v5  ;;  %v905_v19 = vrot.slane %v904_v13, 2  ;;  %v909_v20 = vrot.slane %v1980_v14, 4 }
 0x22b   :  { %v896_v21 = vadd.f32 %v895_v15, %v894_v9  ;;  %v900_v22 = vadd.f32 %v899_v16, %v898_v10 }
 0x22c   :  { %1601 = vrcp.f32 %v884_v17  ;;  %v906_v23 = vadd.f32 %v905_v19, %v904_v13  ;;  %v910_v24 = vadd.f32 %v1980_v14, %v909_v20 }
 0x22d   :  { %1603 = vrcp.f32 %v896_v21  ;;  %v901_v25 = vrot.slane %v900_v22, 1 }
 0x22e   :  { %v1596_v26 = vpop.eup %1595  ;;  %v907_v28 = vrot.slane %v906_v23, 1  ;;  %v911_v29 = vrot.slane %v910_v24, 2 }
 0x22f   :  { %v924_v53 = vmul.f32 %v1596_v26, %v1952_v30  ;;  %v902_v31 = vadd.f32 %v901_v25, %v900_v22  ;;  %v111_v25 = vld [vmem:[#allocation2 + $0x38] sm:$0xff] }
 0x230   :  { %v908_v32 = vadd.f32 %v907_v28, %v906_v23  ;;  %v912_v33 = vadd.f32 %v911_v29, %v910_v24 }
 0x231   :  { %v932_v34 = vmul.f32 %v924_v53, %v105_v27  ;;  %1605 = vrcp.f32 %v902_v31 }
 0x232   :  { %v1598_v35 = vpop.eup %1597  ;;  %1607 = vrcp.f32 %v908_v32  ;;  %v913_v38 = vrot.slane %v912_v33, 1 }
 0x233   :  { %v1600_v40 = vpop.eup %1599  ;;  %v923_v41 = vmul.f32 %v1598_v35, %v1956_v37  ;;  %v946_v57 = vsel %vm515_vm2, %v932_v34, 0.0 }
 0x234   :  { %v926_v43 = vmul.f32 %v1600_v40, %v1958_v39  ;;  %v914_v44 = vadd.f32 %v913_v38, %v912_v33  ;;  %v947_v46 = vrot.slane %v946_v57, 4 }
 0x235   :  { %v931_v30 = vmul.f32 %v923_v41, %v104_v36 }
 0x236   :  { %v1602_v48 = vpop.eup %1601  ;;  %1609 = vrcp.f32 %v914_v44  ;;  %v934_v50 = vmul.f32 %v926_v43, %v107_v42  ;;  %v948_v51 = vadd.f32 %v947_v46, %v946_v57 }
 0x237   :  { %v1604_v52 = vpop.eup %1603  ;;  %v925_v54 = vmul.f32 %v1602_v48, %v1963_v45  ;;  %v939_v56 = vsel %vm515_vm2, %v931_v30, 0.0  ;;  %v110_v45 = vld [vmem:[#allocation2 + $0x30] sm:$0xff] }
 0x238   :  { %v927_v37 = vmul.f32 %v1604_v52, %v1966_v47  ;;  %v940_v58 = vrot.slane %v939_v56, 4  ;;  %v960_v59 = vsel %vm515_vm2, %v934_v50, 0.0  ;;  %v949_v61 = vrot.slane %v948_v51, 2 }
 0x239   :  { %v933_v39 = vmul.f32 %v925_v54, %v106_v49  ;;  %v961_v62 = vrot.slane %v960_v59, 4 }
 0x23a   :  { %v935_v1 = vmul.f32 %v927_v37, %v108_v55  ;;  %v941_v2 = vadd.f32 %v940_v58, %v939_v56  ;;  %v950_v13 = vadd.f32 %v949_v61, %v948_v51 }
 0x23b   :  { %v1606_v3 = vpop.eup %1605  ;;  %v953_v5 = vsel %vm515_vm2, %v933_v39, 0.0  ;;  %v962_v6 = vadd.f32 %v961_v62, %v960_v59 }
 0x23c   :  { %v1608_v8 = vpop.eup %1607  ;;  %v928_v9 = vmul.f32 %v1606_v3, %v1972_v60  ;;  %v942_v10 = vrot.slane %v941_v2, 2  ;;  %v954_v11 = vrot.slane %v953_v5, 4  ;;  %v967_v16 = vsel %vm515_vm2, %v935_v1, 0.0  ;;  %v997_v3 = vld [vmem:[#allocation7 + $0x18] sm:$0xff] }
 0x23d   :  { %v929_v47 = vmul.f32 %v1608_v8, %v1974_v63  ;;  %v963_v15 = vrot.slane %v962_v6, 2  ;;  %v968_v23 = vrot.slane %v967_v16, 4  ;;  %v951_v29 = vrot.slane %v950_v13, 1 }
 0x23e   :  { %v936_v17 = vmul.f32 %v928_v9, %v109_v4  ;;  %v943_v19 = vadd.f32 %v942_v10, %v941_v2  ;;  %v955_v20 = vadd.f32 %v954_v11, %v953_v5  ;;  %v1001_v4 = vld [vmem:[#allocation7 + $0x40] sm:$0xff]  ;;  %v1010_v9 = vld [vmem:[#allocation7 + $0x98] sm:$0xff] }
 0x23f   :  { %v937_v21 = vmul.f32 %v929_v47, %v110_v45  ;;  %v964_v22 = vadd.f32 %v963_v15, %v962_v6  ;;  %v969_v63 = vadd.f32 %v968_v23, %v967_v16  ;;  %v952_v42 = vadd.f32 %v951_v29, %v950_v13  ;;  %v1006_v45 = vld [vmem:[#allocation7 + $0x70] sm:$0xff]  ;;  %v1005_v15 = vld [vmem:[#allocation7 + $0x68] sm:$0xff]  ;;  %v1220_v23 = vld [vmem:[#allocation9] sm:$0xff] }
 0x240   :  { %v1610_v24 = vpop.eup %1609  ;;  %v944_v26 = vrot.slane %v943_v19, 1  ;;  %v956_v27 = vrot.slane %v955_v20, 2  ;;  %v974_v60 = vsel %vm515_vm2, %v936_v17, 0.0  ;;  %v1514_v11 = vpack.c.bf16 %v1001_v4, %v997_v3  ;;  %v1009_v16 = vld [vmem:[#allocation7 + $0x90] sm:$0xff]  ;;  %v1224_v29 = vld [vmem:[#allocation9 + $0x20] sm:$0xff] }
 0x241   :  { %v930_v28 = vmul.f32 %v1610_v24, %v1980_v14  ;;  %v975_v53 = vrot.slane %v974_v60, 4  ;;  %v965_v32 = vrot.slane %v964_v22, 1  ;;  %v981_v33 = vsel %vm515_vm2, %v937_v21, 0.0  ;;  %v1221_v24 = vld [vmem:[#allocation9 + $0x8] sm:$0xff] }
 0x242   :  { %v957_v31 = vadd.f32 %v956_v27, %v955_v20  ;;  %v945_v35 = vadd.f32 %v944_v26, %v943_v19  ;;  %v970_v36 = vrot.slane %v969_v63, 2  ;;  %v982_v41 = vrot.slane %v981_v33, 4  ;;  %v1222_v27 = vld [vmem:[#allocation9 + $0x10] sm:$0xff] }
 0x243   :  { %v938_v34 = vmul.f32 %v930_v28, %v111_v25  ;;  %v976_v38 = vadd.f32 %v975_v53, %v974_v60  ;;  %v966_v48 = vadd.f32 %v965_v32, %v964_v22  ;;  %v1516_v13 = vpack.c.bf16 %v1010_v9, %v1006_v45  ;;  %v1223_v60 = vld [vmem:[#allocation9 + $0x18] sm:$0xff]  ;;  %v1226_v32 = vld [vmem:[#allocation9 + $0x30] sm:$0xff] }
 0x244   :  { %v958_v40 = vrot.slane %v957_v31, 1  ;;  %v971_v57 = vadd.f32 %v970_v36, %v969_v63  ;;  %v983_v46 = vadd.f32 %v982_v41, %v981_v33  ;;  %v1020_v51 = vsel %vm1019_vm3, %v952_v42, %v945_v35  ;;  %v1225_v63 = vld [vmem:[#allocation9 + $0x28] sm:$0xff]  ;;  %v1227_v33 = vld [vmem:[#allocation9 + $0x38] sm:$0xff]  ;;  %v1228_v35 = vld [vmem:[#allocation9 + $0x40] sm:$0xff] }
 0x245   :  { %v977_v43 = vrot.slane %v976_v38, 2  ;;  %v988_v14 = vsel %vm515_vm2, %v938_v34, 0.0  ;;  %v1518_v19 = vpack.c.bf16 %v1009_v16, %v1005_v15  ;;  %v1521_v25 = vpack.c.bf16 %v1221_v24, %v1220_v23  ;;  %v1229_v36 = vld [vmem:[#allocation9 + $0x48] sm:$0xff]  ;;  %v1231_v41 = vld [vmem:[#allocation9 + $0x58] sm:$0xff] }
 0x246   :  { %v959_v44 = vadd.f32 %v958_v40, %v957_v31  ;;  %v989_v30 = vrot.slane %v988_v14, 4  ;;  %v972_v49 = vrot.slane %v971_v57, 1  ;;  %v984_v52 = vrot.slane %v983_v46, 2  ;;  %v1230_v40 = vld [vmem:[#allocation9 + $0x50] sm:$0xff] }
 0x247   :  { %v978_v50 = vadd.f32 %v977_v43, %v976_v38  ;;  %v1751_v26 = vmov 0.0|0.0   ;;  %v1524_v28 = vpack.c.bf16 %v1223_v60, %v1222_v27  ;;  %v1527_v53 = vpack.c.bf16 %v1225_v63, %v1224_v29  ;;  %v1233_v43 = vld [vmem:[#allocation9 + $0x68] sm:$0xff] }
 0x248   :  { %v990_v54 = vadd.f32 %v989_v30, %v988_v14  ;;  %v1022_v55 = vsel %vm1021_vm4, %v959_v44, %v1020_v51  ;;  %v973_v56 = vadd.f32 %v972_v49, %v971_v57  ;;  %v985_v59 = vadd.f32 %v984_v52, %v983_v46  ;;  %1520 = vmatprep.subr.bf16.mxu1 %v1751_v26  ;;  %v1232_v57 = vld [vmem:[#allocation9 + $0x60] sm:$0xff]  ;;  %v1234_v44 = vld [vmem:[#allocation9 + $0x70] sm:$0xff]  ;;  %v1235_v46 = vld [vmem:[#allocation9 + $0x78] sm:$0xff] }
 0x249   :  { %v979_v37 = vrot.slane %v978_v50, 1  ;;  %v1024_v58 = vsel %vm1023_vm5, %v966_v48, %v1022_v55  ;;  %1522 = vmatpush3.bf16.msra.mxu1 %v1521_v25  ;;  %v1530_v34 = vpack.c.bf16 %v1227_v33, %v1226_v32  ;;  %v1533_v38 = vpack.c.bf16 %v1229_v36, %v1228_v35  ;;  %v123_v49 = vld [vmem:[%s2044_s8 + $0x5] sm:$0x7]  ;;  %v1347_v27 = vld [vmem:[%s2044_s8 + $0x8] ss:$0 sm:$0xff] }
 0x24a   :  { %v991_v39 = vrot.slane %v990_v54, 2  ;;  %v1026_v62 = vsel %vm1025_vm6, %v973_v56, %v1024_v58  ;;  %v986_v1 = vrot.slane %v985_v59, 1  ;;  %1523 = vmatprep.subr.bf16.mxu1 %v1751_v26  ;;  %v1536_v42 = vpack.c.bf16 %v1231_v41, %v1230_v40 }
 0x24b   :  { %v980_v61 = vadd.f32 %v979_v37, %v978_v50  ;;  %v1539_v14 = vpack.c.bf16 %v1233_v43, %v1232_v57  ;;  %v1542_v30 = vpack.c.bf16 %v1235_v46, %v1234_v44  ;;  %v338_v48 = vsub.s32 1, %v1921_v7 }
 0x24c   :  { %v992_v2 = vadd.f32 %v991_v39, %v990_v54  ;;  %v987_v5 = vadd.f32 %v986_v1, %v985_v59  ;;  %v335_v51 = vrot.slane %v123_v49, %v1927_v18 }
 0x24d   :  { %v1028_v8 = vsel %vm1027_vm7, %v980_v61, %v1026_v62  ;;  %1525 = vmatpush3.bf16.msra.mxu1 %v1524_v28  ;;  %v339_v50 = vrot.slane %v123_v49, %v338_v48 }
 0x24e   :  { %v993_v6 = vrot.slane %v992_v2, 1  ;;  %v1030_v47 = vsel %vm1029_vm8, %v987_v5, %v1028_v8  ;;  %1526 = vmatprep.subr.bf16.mxu1 %v1751_v26  ;;  %v347_v37 = vadd.f32 %v335_v51, %v1924_v12  ;;  %v342_v8 = vsub.s32 2, %v1921_v7  ;;  %v1621_v7 = vld [vmem:[%s2037_s1] sm:$0xff] }
 0x250   :  { %v994_v10 = vadd.f32 %v993_v6, %v992_v2  ;;  %v343_v12 = vrot.slane %v123_v49, %v342_v8 }
 0x251   :  { %1528 = vmatpush3.bf16.msra.mxu1 %v1527_v53 }
 0x252   :  { %v1032_v17 = vsel %vm1031_vm9, %v994_v10, %v1030_v47  ;;  %1529 = vmatprep.subr.bf16.mxu1 %v1751_v26 }
 0x253   :  { %1343 = vmatmul.mubr.msk.f32.vlgmr.msra.gmra.mrb[2].mxu0 %vm515_vm2, %v1032_v17 }
 0x254   :  { %1515 = vmatpush1.bf16.msra.mxu0 %v1514_v11  ;;  %1170 = vmatprep.mubr.f32.mxu0 %v1749_v0  ;;  %v122_v0 = vld [vmem:[%s2044_s8 + $0x2] sm:$0x7] }
 0x255   :  { %1517 = vmatprep.subr.bf16.mxu0 %v1516_v13  ;;  %1531 = vmatpush3.bf16.msra.mxu1 %v1530_v34  ;;  %v1184_v52 = vrot.slane %v122_v0, %v1927_v18  ;;  %v1188_v54 = vrot.slane %v122_v0, %v338_v48  ;;  %v1192_v10 = vrot.slane %v122_v0, %v342_v8 }
 0x256   :  { %1532 = vmatprep.subr.bf16.mxu1 %v1751_v26 }
 0x258   :  { %1519 = vmatpush1.bf16.msra.mxu0 %v1518_v19 }
 0x259   :  { %1534 = vmatpush3.bf16.msra.mxu1 %v1533_v38 }
 0x25a   :  { %1535 = vmatprep.subr.bf16.mxu1 %v1751_v26 }
 0x25b   :  { %1344 = vmatmul.mubr.msk.f32.vlgmr.msra.gmra.mrb[12].mxu0 %vm515_vm2, %v1032_v17 }
 0x25d   :  { %1537 = vmatpush3.bf16.msra.mxu1 %v1536_v42 }
 0x25e   :  { %1538 = vmatprep.subr.bf16.mxu1 %v1751_v26 }
 0x261   :  { %1540 = vmatpush3.bf16.msra.mxu1 %v1539_v14 }
 0x262   :  { %v326_v20 = vpop.f32.mrb[0].mxu1  ;;  %1541 = vmatprep.subr.bf16.mxu1 %v1751_v26 }
 0x263   :  { %v2003_v21 = vpop.f32.mrb[1].mxu1  ;;  %v348_v56 = vadd.f32 %v339_v50, %v326_v20 }
 0x264   :  { %v349_v11 = vadd.f32 %v343_v12, %v2003_v21 }
 0x265   :  { %1543 = vmatpush3.bf16.msra.mxu1 %v1542_v30 }
 0x266   :  { %v2005_v22 = vpop.f32.mrb[2].mxu1 }
 0x267   :  { %v2007_v31 = vpop.f32.mrb[3].mxu1 }
 0x326   :  { %v1101_v55 = vpop.f32.mrb[2].mxu0 }
 0x327   :  { %v1196_v58 = vadd.f32 %v1184_v52, %v1101_v55  ;;  %v1103_v59 = vpop.f32.mrb[3].mxu0 }
 0x328   :  { %v1197_v39 = vadd.f32 %v1188_v54, %v1103_v59 }
 0x329   :  { %v1199_v61 = vadd.f32 %v1196_v58, %v347_v37 }
 0x32a   :  { %v1206_v62 = vadd.f32 %v1197_v39, %v348_v56 }
 0x32b   :  { %v1345_v1 = vmul.f32 -1.442695, %v1199_v61 }
 0x32c   :  { %v1346_v5 = vmul.f32 -1.442695, %v1206_v62 }
 0x32d   :  { %1611 = vpow2.f32 %v1345_v1 }
 0x32e   :  { %v1172_v2 = vpop.f32.mrb[12].mxu0  ;;  %1613 = vpow2.f32 %v1346_v5 }
 0x32f   :  { %v1179_v3 = vadd.f32 %v1172_v2, %v2005_v22  ;;  %v1174_v4 = vpop.f32.mrb[13].mxu0 }
 0x331   :  { %v1198_v15 = vadd.f32 %v1192_v10, %v1179_v3 }
 0x337   :  { %v1612_v6 = vpop.eup %1611 }
 0x338   :  { %v1203_v18 = vadd.f32 1.0, %v1612_v6  ;;  %v1614_v45 = vpop.eup %1613 }
 0x339   :  { %v1210_v9 = vadd.f32 1.0, %v1614_v45 }
 0x33a   :  { %1615 = vrcp.f32 %v1203_v18 }
 0x33b   :  { %1617 = vrcp.f32 %v1210_v9 }
 0x344   :  { %v1616_v47 = vpop.eup %1615 }
 0x345   :  { %v1213_v13 = vmul.f32 %v1616_v47, %v349_v11  ;;  %v1618_v17 = vpop.eup %1617 }
 0x346   :  { %v1216_v19 = vsub.f32 1.0, %v1618_v17  ;;  %v1218_v23 = vmul.f32 %v1621_v7, %v1618_v17 }
 0x347   :  { %v1214_v16 = vadd.f32 %v1213_v13, %v1198_v15 }
 0x349   :  { %1619 = vtanh.f32 %v1214_v16 }
 0x353   :  { %v1620_v20 = vpop.eup %1619 }
 0x354   :  { %v1217_v22 = vmul.f32 %v1620_v20, %v1216_v19 }
 0x356   :  { %v1219_v24 = vadd.f32 %v1218_v23, %v1217_v22 }
 0x358   :  { %1430 = vmatmul.mubr.f32.vlgmr.msra.gmra.mrb[4].mxu1 %v1219_v24  ;;  %1315 = vst [vmem:[%s2046_s10] sm:$0xff] %v1219_v24 }
 0x42b   :  { %v1302_v21 = vpop.f32.mrb[4].mxu1 }
 0x42c   :  { %v1303_v25 = vadd.f32 %v1302_v21, %v2007_v31  ;;  %v1431_v26 = vpop.f32.mrb[5].mxu1 }
 0x42e   :  { %v1306_v60 = vadd.f32 %v1303_v25, %v1174_v4 }
 0x430   :  { %v1313_v28 = vadd.f32 %v1347_v27, %v1306_v60 }
 0x432   :  { %1314 = vst [vmem:[%s2045_s9] sm:$0xff] %v1313_v28 }
 0x433   :  { %1324 = vsyncpa [#allocation3], 1 }
 0x434   :  { %1325 = vsyncpa [#allocation5], 1 }
 0x435   :  { %1326 = vsyncpa [#allocation8], 1 }

</bundles_post_ra>
